<compile_context>
chip_gen: v7x
topology: tpu7x:2x2x1
jax: 0.10.0
libtpu: 0.0.40
codegen_flags: <defaults>
</compile_context>

<pallas_src>
import math

import numpy as np

import jax
import jax.numpy as jnp
from jax import lax
from jax.experimental import pallas as pl
from jax.experimental.pallas import tpu as pltpu

_HP = lax.Precision.HIGHEST


def _sinpos_packed_kernel(t_ref, freq_ref, spread_ref, psin_ref, pcos_ref, o_ref):
    """g = 256//dim embeddings per output row (width = 256 lanes).

    t_ref:      (TM, g)    f32 timesteps, g per row
    freq_ref:   (1, 128)   f_{k} tiled per embedding slot (grid-constant)
    spread_ref: (g, 128)   0/1 one-hot: arg-lane l belongs to embedding l//half
    psin_ref:   (128, 256) 0/1 scatter: sin-arg lane -> output lane
    pcos_ref:   (128, 256) 0/1 scatter: cos-arg lane -> output lane
    o_ref:      (TM, 256)
    """
    # Exact lane-spread of t (0/1 matrix + HIGHEST => no bf16 truncation of
    # t ~ 1e3), then an exact elementwise f32 multiply by the frequencies, so
    # `args` is bit-identical to the reference t[:, None] * f[None, :].
    t_spread = jnp.dot(t_ref[...], spread_ref[...],
                       preferred_element_type=jnp.float32, precision=_HP)
    args = t_spread * freq_ref[...]                    # (TM, 128), lane-dense
    s = jnp.sin(args)                                  # one pass each ->
    c = jnp.cos(args)                                  # 1 transcendental / output elem
    # Interleave [sin | cos] per embedding with one-hot scatters on the idle MXU
    # (exact: 0/1 matrices + HIGHEST, one contributing term per output lane).
    out = (jnp.dot(s, psin_ref[...], preferred_element_type=jnp.float32, precision=_HP)
           + jnp.dot(c, pcos_ref[...], preferred_element_type=jnp.float32, precision=_HP))
    o_ref[...] = out.astype(o_ref.dtype)


def _sinpos_split_kernel(t_ref, freq_ref, o_ref):
    """g == 1: one embedding per row; two half-slice stores, no sin/cos select.

    t_ref: (TM, 1); freq_ref: (1, half); o_ref: (TM, dim)
    """
    half = freq_ref.shape[1]
    args = t_ref[...] * freq_ref[...]                  # (TM, half)
    o_ref[:, :half] = jnp.sin(args).astype(o_ref.dtype)
    o_ref[:, half:] = jnp.cos(args).astype(o_ref.dtype)


def _reference(time: jax.Array, dim: int) -> jax.Array:
    half_dim = dim // 2
    emb = math.log(10000.0) / (half_dim - 1)
    emb = jnp.exp(jnp.arange(half_dim, dtype=jnp.float32) * -emb)
    emb = time.astype(jnp.float32)[:, None] * emb[None, :]
    return jnp.concatenate([jnp.sin(emb), jnp.cos(emb)], axis=-1)


def _round_up(x: int, m: int) -> int:
    return (x + m - 1) // m * m


def _vmem_budgets():
    """(output-tile byte budget, scoped vmem_limit_bytes), generation-gated."""
    cap = 64 << 20                      # conservative default (v7x per-TC VMEM)
    try:
        cap = int(pltpu.get_tpu_info().vmem_capacity_bytes)
    except Exception:
        pass
    if cap >= (100 << 20):              # v5e / v6e: 128 MiB physical VMEM
        return 8 << 20, 64 << 20
    return 4 << 20, 32 << 20            # v7x: 64 MiB per TensorCore


def _dimension_semantics():
    try:
        kind = jax.devices()[0].device_kind.lower()
    except Exception:
        kind = ""
    if "v7" in kind:
        core_parallel = getattr(pltpu, "CORE_PARALLEL", None)
        if core_parallel is not None:
            return (core_parallel,)     # shard batch grid across both v7x TCs
    return ("parallel",)


def sinusoidal_position_embeddings(time: jax.Array, dim: int, *,
                                   out_dtype=jnp.float32,
                                   force_pallas: bool = False,
                                   small_fallback_elems: int = 1 << 15) -> jax.Array:
    """time: (B,) float -> (B, dim) = [sin(t*f_k) | cos(t*f_k)] per row."""
    assert dim % 2 == 0, "dim must be even (sin/cos halves)"
    assert dim >= 4, "dim must be >= 4 (half_dim - 1 would be zero)"
    B = time.shape[0]

    # Tiny problems: the fused XLA expression beats pallas_call fixed cost.
    if not force_pallas and B * dim < small_fallback_elems:
        return _reference(time, dim).astype(out_dtype)

    half = dim // 2
    time_f32 = time.astype(jnp.float32)
    # Frequencies computed with the exact same expression as the reference.
    scale = math.log(10000.0) / (half - 1)
    freqs = jnp.exp(jnp.arange(half, dtype=jnp.float32) * -scale)   # (half,)

    itemsize = jnp.dtype(out_dtype).itemsize
    sub = 16 if itemsize == 2 else 8    # native sublane tiling for 16-bit outputs

    # Lane packing: for dim < 256 dividing 256, pack g = 256//dim embeddings
    # per 256-lane output row (free row-major reshape back in the wrapper).
    packed = (dim < 256) and (256 % dim == 0)
    g = (256 // dim) if packed else 1
    # TODO(synk): dims that don't divide 256 and are < 256 keep narrow masked stores.
    width = g * dim

    tile_budget, vmem_limit = _vmem_budgets()
    bytes_per_row = width * itemsize
    budget_rows = max(sub, (tile_budget // bytes_per_row) // sub * sub)

    rows_needed = -(-B // g)
    tm = min(budget_rows, _round_up(rows_needed, sub))
    grid0 = -(-rows_needed // tm)
    rows_pad = grid0 * tm
    b_pad = rows_pad * g

    # Pad (zeros -> sin(0)/cos(0), harmless, trimmed after) so the grid tiles evenly.
    t_packed = jnp.pad(time_f32, (0, b_pad - B)).reshape(rows_pad, g)

    cparams = pltpu.CompilerParams(dimension_semantics=_dimension_semantics(),
                                   vmem_limit_bytes=vmem_limit)

    if packed:
        # Grid-constant one-hot matrices / lane frequencies (hoisted out of the kernel).
        nargs = g * half                                   # == 128
        lane = np.arange(nargs)
        spread = (lane[None, :] // half == np.arange(g)[:, None]).astype(np.float32)
        e, p = lane // half, lane % half
        psin = np.zeros((nargs, width), np.float32)
        psin[lane, e * dim + p] = 1.0
        pcos = np.zeros((nargs, width), np.float32)
        pcos[lane, e * dim + half + p] = 1.0
        freq_lane = jnp.tile(freqs, g).reshape(1, nargs)

        out_packed = pl.pallas_call(
            _sinpos_packed_kernel,
            out_shape=jax.ShapeDtypeStruct((rows_pad, width), out_dtype),
            grid=(grid0,),
            in_specs=[
                pl.BlockSpec((tm, g), lambda i: (i, 0)),
                pl.BlockSpec((1, nargs), lambda i: (0, 0)),       # resident constants
                pl.BlockSpec((g, nargs), lambda i: (0, 0)),
                pl.BlockSpec((nargs, width), lambda i: (0, 0)),
                pl.BlockSpec((nargs, width), lambda i: (0, 0)),
            ],
            out_specs=pl.BlockSpec((tm, width), lambda i: (i, 0)),
            compiler_params=cparams,
        )(t_packed, freq_lane, jnp.asarray(spread), jnp.asarray(psin), jnp.asarray(pcos))
    else:
        out_packed = pl.pallas_call(
            _sinpos_split_kernel,
            out_shape=jax.ShapeDtypeStruct((rows_pad, dim), out_dtype),
            grid=(grid0,),
            in_specs=[
                pl.BlockSpec((tm, 1), lambda i: (i, 0)),
                pl.BlockSpec((1, half), lambda i: (0, 0)),        # resident constant
            ],
            out_specs=pl.BlockSpec((tm, dim), lambda i: (i, 0)),
            compiler_params=cparams,
        )(t_packed, freqs.reshape(1, half))

    # Row-major (rows_pad, g*dim) is bit-identical to (b_pad, dim): free reshape,
    # then trim the padded rows.
    return out_packed.reshape(b_pad, dim)[:B]


if __name__ == "__main__":
    key = jax.random.PRNGKey(0)
    B = 16
    # deterministic "timesteps" (positive floats, like diffusion step indices)
    time = jax.random.uniform(key, (B,), dtype=jnp.float32, minval=0.0, maxval=1000.0)

    # f32 checks across: packed paths (dim divides 256, incl. dim=128),
    # lane-aligned split (dim=256) and lane-misaligned split (dim=384).
    # Arguments are computed bit-exactly; tolerance only absorbs sin/cos
    # implementation differences between the Pallas and XLA lowerings.
    for dim in (8, 32, 64, 128, 256, 384):
        out = jax.block_until_ready(
            sinusoidal_position_embeddings(time, dim, force_pallas=True))
        ref = _reference(time, dim)
        assert out.shape == (B, dim), f"bad shape at dim={dim}"
        assert out.dtype == jnp.float32
        assert jnp.allclose(out, ref, atol=2e-4, rtol=2e-4), f"mismatch at dim={dim}"

    # bf16 output path (row tile rounds to a multiple of 16).
    out_bf16 = jax.block_until_ready(
        sinusoidal_position_embeddings(time, 64, out_dtype=jnp.bfloat16,
                                       force_pallas=True))
    assert out_bf16.shape == (B, 64) and out_bf16.dtype == jnp.bfloat16
    assert jnp.allclose(out_bf16.astype(jnp.float32), _reference(time, 64),
                        atol=1e-2, rtol=1e-2), "mismatch at bf16 dim=64"

    print("KERNEL_OK")
</pallas_src>

<mosaic_0001>
module attributes {stable_mosaic.version = 11 : i64} {
  func.func @_sinpos_packed_kernel(%arg0: i32, %arg1: memref<8x32xf32, #tpu.memory_space<vmem>>, %arg2: memref<1x128xf32, #tpu.memory_space<vmem>>, %arg3: memref<32x128xf32, #tpu.memory_space<vmem>>, %arg4: memref<128x256xf32, #tpu.memory_space<vmem>>, %arg5: memref<128x256xf32, #tpu.memory_space<vmem>>, %arg6: memref<8x256xf32, #tpu.memory_space<vmem>>) attributes {dimension_semantics = [#tpu.dimension_semantics<parallel>], iteration_bounds = array<i64: 1>, scalar_prefetch = 0 : i64, scratch_operands = 0 : i64, tpu.core_type = #tpu.core_type<tc>, window_params = [{transform_indices = @transform_0, window_bounds = array<i64: 8, 32>}, {pipeline_mode = #tpu.pipeline_mode<synchronous>, transform_indices = @transform_1, window_bounds = array<i64: 1, 128>}, {pipeline_mode = #tpu.pipeline_mode<synchronous>, transform_indices = @transform_2, window_bounds = array<i64: 32, 128>}, {pipeline_mode = #tpu.pipeline_mode<synchronous>, transform_indices = @transform_3, window_bounds = array<i64: 128, 256>}, {pipeline_mode = #tpu.pipeline_mode<synchronous>, transform_indices = @transform_4, window_bounds = array<i64: 128, 256>}, {transform_indices = @transform_5, window_bounds = array<i64: 8, 256>}]} {
    %c0 = arith.constant 0 : index
    %c0_0 = arith.constant 0 : index
    %0 = vector.load %arg1[%c0, %c0_0] : memref<8x32xf32, #tpu.memory_space<vmem>>, vector<8x32xf32>
    %c0_1 = arith.constant 0 : index
    %c0_2 = arith.constant 0 : index
    %1 = vector.load %arg3[%c0_1, %c0_2] : memref<32x128xf32, #tpu.memory_space<vmem>>, vector<32x128xf32>
    %cst = arith.constant dense<0.000000e+00> : vector<8x128xf32>
    %2 = tpu.matmul %0, %1, %cst {dimension_numbers = #tpu.dot_dimension_numbers<[1], [0], [0], [1], [0, 0, 1, 1], [], []>, precision = #tpu.contract_precision<fp32>} : vector<8x32xf32>, vector<32x128xf32>, vector<8x128xf32> -> vector<8x128xf32>
    %c0_3 = arith.constant 0 : index
    %c0_4 = arith.constant 0 : index
    %3 = vector.load %arg2[%c0_3, %c0_4] : memref<1x128xf32, #tpu.memory_space<vmem>>, vector<1x128xf32>
    %4 = vector.broadcast %3 : vector<1x128xf32> to vector<8x128xf32>
    %5 = arith.mulf %2, %4 : vector<8x128xf32>
    %6 = math.sin %5 : vector<8x128xf32>
    %7 = math.cos %5 : vector<8x128xf32>
    %c0_5 = arith.constant 0 : index
    %c0_6 = arith.constant 0 : index
    %8 = vector.load %arg4[%c0_5, %c0_6] : memref<128x256xf32, #tpu.memory_space<vmem>>, vector<128x256xf32>
    %cst_7 = arith.constant dense<0.000000e+00> : vector<8x256xf32>
    %9 = tpu.matmul %6, %8, %cst_7 {dimension_numbers = #tpu.dot_dimension_numbers<[1], [0], [0], [1], [0, 0, 1, 1], [], []>, precision = #tpu.contract_precision<fp32>} : vector<8x128xf32>, vector<128x256xf32>, vector<8x256xf32> -> vector<8x256xf32>
    %c0_8 = arith.constant 0 : index
    %c0_9 = arith.constant 0 : index
    %10 = vector.load %arg5[%c0_8, %c0_9] : memref<128x256xf32, #tpu.memory_space<vmem>>, vector<128x256xf32>
    %cst_10 = arith.constant dense<0.000000e+00> : vector<8x256xf32>
    %11 = tpu.matmul %7, %10, %cst_10 {dimension_numbers = #tpu.dot_dimension_numbers<[1], [0], [0], [1], [0, 0, 1, 1], [], []>, precision = #tpu.contract_precision<fp32>} : vector<8x128xf32>, vector<128x256xf32>, vector<8x256xf32> -> vector<8x256xf32>
    %12 = arith.addf %9, %11 : vector<8x256xf32>
    %c0_11 = arith.constant 0 : index
    %c0_12 = arith.constant 0 : index
    %13 = vector.load %arg6[%c0_11, %c0_12] : memref<8x256xf32, #tpu.memory_space<vmem>>, vector<8x256xf32>
    tpu.vector_store %arg6[%c0_11, %c0_12], %12 {strides = array<i32>} : memref<8x256xf32, #tpu.memory_space<vmem>>, vector<8x256xf32>,
    return
  }
  func.func @transform_0(%arg0: i32) -> (i32, i32) {
    %c0_i32 = arith.constant 0 : i32
    %c0_i32_0 = arith.constant 0 : i32
    return %arg0, %c0_i32 : i32, i32
  }
  func.func @transform_1(%arg0: i32) -> (i32, i32) {
    %c0_i32 = arith.constant 0 : i32
    %c0_i32_0 = arith.constant 0 : i32
    %c0_i32_1 = arith.constant 0 : i32
    return %c0_i32, %c0_i32_0 : i32, i32
  }
  func.func @transform_2(%arg0: i32) -> (i32, i32) {
    %c0_i32 = arith.constant 0 : i32
    %c0_i32_0 = arith.constant 0 : i32
    %c0_i32_1 = arith.constant 0 : i32
    return %c0_i32, %c0_i32_0 : i32, i32
  }
  func.func @transform_3(%arg0: i32) -> (i32, i32) {
    %c0_i32 = arith.constant 0 : i32
    %c0_i32_0 = arith.constant 0 : i32
    %c0_i32_1 = arith.constant 0 : i32
    return %c0_i32, %c0_i32_0 : i32, i32
  }
  func.func @transform_4(%arg0: i32) -> (i32, i32) {
    %c0_i32 = arith.constant 0 : i32
    %c0_i32_0 = arith.constant 0 : i32
    %c0_i32_1 = arith.constant 0 : i32
    return %c0_i32, %c0_i32_0 : i32, i32
  }
  func.func @transform_5(%arg0: i32) -> (i32, i32) {
    %c0_i32 = arith.constant 0 : i32
    %c0_i32_0 = arith.constant 0 : i32
    return %arg0, %c0_i32 : i32, i32
  }
}

</mosaic_0001>

<bundles_post_ra>
// kernel: tpu_custom_call.1
= control target key start
LH: loop header
LB: loop body
LE: loop exit
PB: predicated region body
PF: predicated region fallthrough
CT: control target
= control target key end

     0   :  { %10 = vsyncpa [#allocation3], 0  ;;  %s4367_s0 = inlined_call_operand.hbm [shape: f32[8,32], index: 0, kind: input, shape index: {}]   ;;  %s4368_s1 = inlined_call_operand.vmem [shape: f32[1,128], index: 1, kind: input, shape index: {}]   ;;  %s4369_s2 = inlined_call_operand.hbm [shape: f32[32,128], index: 2, kind: input, shape index: {}]   ;;  %s4370_s3 = inlined_call_operand.hbm [shape: f32[128,256], index: 3, kind: input, shape index: {}]   ;;  %s4371_s4 = inlined_call_operand.hbm [shape: f32[128,256], index: 4, kind: input, shape index: {}]   ;;  %s4372_s5 = inlined_call_operand.hbm [shape: f32[8,256], index: 5, kind: output, shape index: {}]  }
   0x1   :  { %11 = vsyncpa [#allocation6], 0 }
   0x2   :  { %12 = vsyncpa [#allocation9], 0 }
   0x3   :  { %13 = vsyncpa [#allocation4], 0  ;;  %s3277_s18 = smov [#allocation5]   ;;  %s3159_s22 = scalar_lea.hbm %s4369_s2, 512 }
   0x4   :  { %s31_s19 = sshll.u32 %s3277_s18, 4  ;;  %p3160_p0 = scmp.ne.s32.totalorder %s4369_s2, %s3159_s22  ;;  %s32_s19 = int_to_ptr.vmem [resolvable:$true] %s31_s19 }
   0x5   :  { %p3163_p1 = scmp.lt.u32.totalorder %s3159_s22, %s4369_s2 }
   0x7   :  { %p3165_p2 = pnand %p3163_p1, %p3160_p0 }
   0x9   :  { %3168 = shalt.err (!%p3165_p2)
}
   0xa   :  { %s3169_s27 = scalar_lea.vmem %s32_s19, 512  ;;  %p3174_p4 = scmp.lt.s32.totalorder %s32_s19, %s32_s19 }
   0xb   :  { %p3170_p3 = scmp.ne.s32.totalorder %s32_s19, %s3169_s27  ;;  %p3175_p5 = scmp.lt.s32.totalorder %s3169_s27, %s3169_s27 }
   0xd   :  { %p3176_p6 = por %p3175_p5, %p3174_p4 }
   0xf   :  { %p3177_p7 = pnand %p3176_p6, %p3170_p3 }
  0x11   :  { %3180 = shalt.err (!%p3177_p7)
}
  0x12   :  { %s3278_s28 = smov 128   ;;  %s3279_s29 = smov 8  }
  0x13   :  { %37 = dma.hbm_to_vmem [thread:$0]  %s4369_s2, 512, %s32_s19, [#allocation6], %s3278_s28, %s3278_s28, %s3279_s29  }
  0x14   :  { %s3280_s7 = smov [#allocation2]   ;;  %s3281_s9 = smov [#allocation7]  }
  0x15   :  { %s20_s8 = sshll.u32 %s3280_s7, 4  ;;  %s43_s10 = sshll.u32 %s3281_s9, 4  ;;  %s21_s8 = int_to_ptr.vmem [resolvable:$true] %s20_s8  ;;  %s44_s10 = int_to_ptr.vmem [resolvable:$true] %s43_s10 }
  0x16   :  { %s3181_s13 = scalar_lea.hbm %s4367_s0, 128 }
  0x17   :  { %p3182_p8 = scmp.ne.s32.totalorder %s4367_s0, %s3181_s13  ;;  %p3185_p9 = scmp.lt.u32.totalorder %s3181_s13, %s4367_s0 }
  0x19   :  { %p3187_p10 = pnand %p3185_p9, %p3182_p8 }
  0x1b   :  { %3190 = shalt.err (!%p3187_p10)
}
  0x1c   :  { %s3191_s2 = scalar_lea.vmem %s21_s8, 128  ;;  %p3196_p12 = scmp.lt.s32.totalorder %s21_s8, %s21_s8 }
  0x1d   :  { %p3192_p11 = scmp.ne.s32.totalorder %s21_s8, %s3191_s2  ;;  %p3197_p13 = scmp.lt.s32.totalorder %s3191_s2, %s3191_s2 }
  0x1f   :  { %p3198_p0 = por %p3197_p13, %p3196_p12 }
  0x21   :  { %p3199_p1 = pnand %p3198_p0, %p3192_p11 }
  0x23   :  { %3202 = shalt.err (!%p3199_p1)
}
  0x24   :  { %23 = dma.hbm_to_vmem [thread:$0]  %s4367_s0, 128, %s21_s8, [#allocation3]  }
  0x25   :  { %s3203_s22 = scalar_lea.hbm %s4370_s3, 4096 }
  0x26   :  { %p3204_p2 = scmp.ne.s32.totalorder %s4370_s3, %s3203_s22  ;;  %p3207_p3 = scmp.lt.u32.totalorder %s3203_s22, %s4370_s3 }
  0x28   :  { %p3209_p4 = pnand %p3207_p3, %p3204_p2 }
  0x2a   :  { %3212 = shalt.err (!%p3209_p4)
}
  0x2b   :  { %s3213_s27 = scalar_lea.vmem %s44_s10, 4096  ;;  %p3218_p6 = scmp.lt.s32.totalorder %s44_s10, %s44_s10 }
  0x2c   :  { %p3214_p5 = scmp.ne.s32.totalorder %s44_s10, %s3213_s27  ;;  %p3219_p7 = scmp.lt.s32.totalorder %s3213_s27, %s3213_s27 }
  0x2e   :  { %p3220_p8 = por %p3219_p7, %p3218_p6 }
  0x30   :  { %p3221_p9 = pnand %p3220_p8, %p3214_p5 }
  0x32   :  { %3224 = shalt.err (!%p3221_p9)
}
  0x33   :  { %s3282_s0 = smov 256   ;;  %s3283_s28 = smov 16  }
  0x34   :  { %49 = dma.hbm_to_vmem [thread:$0]  %s4370_s3, 4096, %s44_s10, [#allocation6], %s3282_s0, %s3282_s0, %s3283_s28  }
  0x35   :  { %s3284_s6 = smov [#allocation8]   ;;  %s3225_s11 = scalar_lea.hbm %s4371_s4, 4096 }
  0x36   :  { %s55_s7 = sshll.u32 %s3284_s6, 4  ;;  %p3226_p10 = scmp.ne.s32.totalorder %s4371_s4, %s3225_s11  ;;  %s56_s7 = int_to_ptr.vmem [resolvable:$true] %s55_s7 }
  0x37   :  { %p3229_p11 = scmp.lt.u32.totalorder %s3225_s11, %s4371_s4 }
  0x39   :  { %p3231_p12 = pnand %p3229_p11, %p3226_p10 }
  0x3b   :  { %3234 = shalt.err (!%p3231_p12)
}
  0x3c   :  { %s3235_s16 = scalar_lea.vmem %s56_s7, 4096  ;;  %p3240_p0 = scmp.lt.s32.totalorder %s56_s7, %s56_s7 }
  0x3d   :  { %p3236_p13 = scmp.ne.s32.totalorder %s56_s7, %s3235_s16  ;;  %p3241_p1 = scmp.lt.s32.totalorder %s3235_s16, %s3235_s16 }
  0x3f   :  { %p3242_p2 = por %p3241_p1, %p3240_p0 }
  0x41   :  { %p3243_p3 = pnand %p3242_p2, %p3236_p13 }
  0x43   :  { %3246 = shalt.err (!%p3243_p3)
}
  0x44   :  { %61 = dma.hbm_to_vmem [thread:$0]  %s4371_s4, 4096, %s56_s7, [#allocation9], %s3282_s0, %s3282_s0, %s3283_s28  }
  0x45   :  { %3269 = dma.done.wait [#allocation3], 128  }
  0x46   :  { %3270 = vsyncadd [#allocation3], 4294967168 }
  0x47   :  { %3271 = dma.done.wait [#allocation6], 4608  }
  0x48   :  { %3272 = vsyncadd [#allocation6], 4294962688 }
  0x49   :  { %3273 = dma.done.wait [#allocation9], 4096  }
  0x4a   :  { %3274 = vsyncadd [#allocation9], 4294963200  ;;  %v3285_v0 = vmov 0.0|0.0   ;;  %vm3286_vm0 = vmmov 0   ;;  %v4373_v1 = vmov 0.0   ;;  %vm79_vm1 = vcmask 261120  }
  0x4b   :  { %2681 = vmatprep.subr.bf16.mxu0 %v3285_v0  ;;  %2623 = vmatprep.mubr.msk.f32.mxu0 %vm3286_vm0, %v4373_v1  ;;  %v75_v2 = vld [vmem:[#allocation5] sm:$0xff]  ;;  %v76_v3 = vld [vmem:[#allocation5 + $0x8] sm:$0xff]  ;;  %v77_v4 = vld [vmem:[#allocation5 + $0x10] sm:$0xff] }
  0x4c   :  { %1694 = vmatprep.mubr.f32.mxu1 %v4373_v1  ;;  %v84_v5 = vand.u32 4294901760, %v75_v2  ;;  %v87_v6 = vand.u32 4294901760, %v76_v3  ;;  %v78_v7 = vld [vmem:[#allocation5 + $0x18] sm:$0xff]  ;;  %v90_v8 = vand.u32 4294901760, %v77_v4  ;;  %v3399_v41 = vld [vmem:[#allocation8 + $0x8] sm:$0xff]  ;;  %v815_v45 = vld [vmem:[#allocation8] sm:$0xff] }
  0x4d   :  { %v74_v9 = vld [vmem:[#allocation2] sm:$0xff]  ;;  %v93_v10 = vand.u32 4294901760, %v78_v7  ;;  %v847_v43 = vand.u32 4294901760, %v3399_v41  ;;  %v817_v46 = vld [vmem:[#allocation8 + $0x10] sm:$0xff]  ;;  %v849_v47 = vand.u32 4294901760, %v815_v45  ;;  %v820_v51 = vld [vmem:[#allocation8 + $0x28] sm:$0xff] }
  0x4e   :  { %v81_v11 = vsel %vm79_vm1, %v74_v9, 0  ;;  %v2682_v12 = vpack.c.bf16 %v87_v6, %v84_v5  ;;  %v164_v13 = vsub.f32 %v75_v2, %v84_v5  ;;  %v171_v14 = vsub.f32 %v76_v3, %v87_v6  ;;  %v3401_v42 = vld [vmem:[#allocation8 + $0x18] sm:$0xff]  ;;  %v819_v55 = vld [vmem:[#allocation8 + $0x20] sm:$0xff]  ;;  %v821_v56 = vld [vmem:[#allocation8 + $0x30] sm:$0xff] }
  0x4f   :  { %v178_v15 = vsub.f32 %v77_v4, %v90_v8  ;;  %v185_v16 = vsub.f32 %v78_v7, %v93_v10  ;;  %v152_v17 = vand.u32 4294901760, %v81_v11  ;;  %v2685_v18 = vpack.c.bf16 %v93_v10, %v90_v8  ;;  %v822_v52 = vld [vmem:[#allocation8 + $0x38] sm:$0xff]  ;;  %v824_v61 = vld [vmem:[#allocation8 + $0x48] sm:$0xff]  ;;  %v823_v2 = vld [vmem:[#allocation8 + $0x40] sm:$0xff] }
  0x50   :  { %2683 = vmatpush3.bf16.msra.mxu0 %v2682_v12  ;;  %v165_v19 = vand.u32 4294901760, %v164_v13  ;;  %v172_v20 = vand.u32 4294901760, %v171_v14  ;;  %v2694_v37 = vpack.c.bf16 %v171_v14, %v164_v13  ;;  %v851_v44 = vand.u32 4294901760, %v3401_v42  ;;  %v826_v62 = vld [vmem:[#allocation8 + $0x58] sm:$0xff]  ;;  %v825_v3 = vld [vmem:[#allocation8 + $0x50] sm:$0xff]  ;;  %v828_v8 = vld [vmem:[#allocation8 + $0x68] sm:$0xff] }
  0x51   :  { %v179_v21 = vand.u32 4294901760, %v178_v15  ;;  %2684 = vmatprep.subr.bf16.mxu0 %v3285_v0  ;;  %v153_v22 = vsub.f32 %v81_v11, %v152_v17  ;;  %v186_v23 = vand.u32 4294901760, %v185_v16  ;;  %v2697_v38 = vpack.c.bf16 %v185_v16, %v178_v15  ;;  %v830_v9 = vld [vmem:[#allocation8 + $0x78] sm:$0xff] }
  0x52   :  { %v166_v24 = vsub.f32 %v164_v13, %v165_v19  ;;  %v173_v25 = vsub.f32 %v171_v14, %v172_v20  ;;  %v2706_v39 = vpack.c.bf16 %v172_v20, %v165_v19  ;;  %v853_v48 = vand.u32 4294901760, %v817_v46  ;;  %v829_v13 = vld [vmem:[#allocation8 + $0x70] sm:$0xff]  ;;  %v834_v19 = vld [vmem:[#allocation8 + $0x98] sm:$0xff]  ;;  %v831_v20 = vld [vmem:[#allocation8 + $0x80] sm:$0xff] }
  0x53   :  { %v180_v26 = vsub.f32 %v178_v15, %v179_v21  ;;  %v154_v27 = vand.u32 4294901760, %v153_v22  ;;  %v187_v28 = vsub.f32 %v185_v16, %v186_v23  ;;  %v2709_v40 = vpack.c.bf16 %v186_v23, %v179_v21  ;;  %v833_v21 = vld [vmem:[#allocation8 + $0x90] sm:$0xff] }
  0x54   :  { %2686 = vmatpush3.bf16.msra.mxu0 %v2685_v18  ;;  %v167_v29 = vand.u32 4294901760, %v166_v24  ;;  %v174_v30 = vand.u32 4294901760, %v173_v25  ;;  %v3409_v49 = vpack.c.bf16 %v851_v44, %v847_v43  ;;  %v3411_v50 = vpack.c.bf16 %v853_v48, %v849_v47 }
  0x55   :  { %v155_v31 = vsub.f32 %v153_v22, %v154_v27  ;;  %2687 = vmatprep.subr.bf16.mxu0 %v3285_v0  ;;  %v181_v33 = vand.u32 4294901760, %v180_v26  ;;  %v188_v34 = vand.u32 4294901760, %v187_v28  ;;  %v855_v53 = vand.u32 4294901760, %v820_v51 }
  0x56   :  { %v2688_v32 = vpack.c.bf16 %v174_v30, %v167_v29  ;;  %4540 = vst [vmem:[#allocation15_spill] sm:$0xff] %v3409_v49  ;;  %4541 = vst [vmem:[#allocation16_spill] sm:$0xff] %v3411_v50  ;;  %2878 = vmatprep.subr.bf16.mxu1 %v3409_v49  ;;  %v859_v54 = vand.u32 4294901760, %v822_v52  ;;  %v857_v57 = vand.u32 4294901760, %v819_v55  ;;  %v861_v58 = vand.u32 4294901760, %v821_v56 }
  0x57   :  { %v156_v35 = vand.u32 4294901760, %v155_v31  ;;  %v2691_v36 = vpack.c.bf16 %v188_v34, %v181_v33  ;;  %2880 = vmatpush1.bf16.msra.mxu1 %v3411_v50  ;;  %v863_v63 = vand.u32 4294901760, %v824_v61  ;;  %v865_v4 = vand.u32 4294901760, %v823_v2 }
  0x58   :  { %v3417_v59 = vpack.c.bf16 %v859_v54, %v855_v53  ;;  %v3419_v60 = vpack.c.bf16 %v861_v58, %v857_v57  ;;  %v869_v5 = vand.u32 4294901760, %v825_v3  ;;  %v871_v10 = vand.u32 4294901760, %v828_v8 }
  0x59   :  { %2624 = vmatmul.mubr.f32.vlgmr.msra.gmra.mrb[0].mxu0 %v156_v35  ;;  %v875_v11 = vand.u32 4294901760, %v830_v9  ;;  %v877_v15 = vand.u32 4294901760, %v829_v13  ;;  %v883_v23 = vand.u32 4294901760, %v834_v19  ;;  %v3441_v24 = vsub.f32 %v815_v45, %v849_v47  ;;  %v837_v47 = vld [vmem:[#allocation8 + $0xb0] sm:$0xff] }
  0x5a   :  { %2689 = vmatpush3.bf16.msra.mxu0 %v2688_v32  ;;  %2634 = vmatprep.mubr.msk.f32.mxu0 %vm3286_vm0, %v4373_v1  ;;  %4542 = vst [vmem:[#allocation17_spill] sm:$0xff] %v3417_v59  ;;  %4543 = vst [vmem:[#allocation18_spill] sm:$0xff] %v3419_v60  ;;  %v3427_v7 = vpack.c.bf16 %v869_v5, %v865_v4  ;;  %v3443_v25 = vsub.f32 %v817_v46, %v853_v48  ;;  %v881_v26 = vand.u32 4294901760, %v831_v20  ;;  %v840_v48 = vld [vmem:[#allocation8 + $0xc8] sm:$0xff] }
  0x5b   :  { %2690 = vmatprep.subr.bf16.mxu0 %v3285_v0  ;;  %2882 = vmatprep.subr.bf16.mxu1 %v3417_v59  ;;  %v3433_v16 = vpack.c.bf16 %v875_v11, %v871_v10  ;;  %v3445_v28 = vsub.f32 %v820_v51, %v855_v53  ;;  %v3447_v29 = vsub.f32 %v822_v52, %v859_v54  ;;  %v842_v51 = vld [vmem:[#allocation8 + $0xd8] sm:$0xff] }
  0x5c   :  { %2884 = vmatpush1.bf16.msra.mxu1 %v3419_v60  ;;  %4545 = vst [vmem:[#allocation20_spill] sm:$0xff] %v3427_v7  ;;  %v3449_v30 = vsub.f32 %v819_v55, %v857_v57  ;;  %v3451_v31 = vsub.f32 %v821_v56, %v861_v58  ;;  %v3453_v32 = vsub.f32 %v824_v61, %v863_v63  ;;  %v839_v56 = vld [vmem:[#allocation8 + $0xc0] sm:$0xff] }
  0x5d   :  { %4546 = vst [vmem:[#allocation21_spill] sm:$0xff] %v3433_v16  ;;  %v3457_v34 = vsub.f32 %v823_v2, %v865_v4  ;;  %v3459_v35 = vsub.f32 %v825_v3, %v869_v5  ;;  %v3467_v46 = vsub.f32 %v829_v13, %v877_v15  ;;  %v3473_v54 = vsub.f32 %v834_v19, %v883_v23  ;;  %v841_v4 = vld [vmem:[#allocation8 + $0xd0] sm:$0xff]  ;;  %v843_v13 = vld [vmem:[#allocation8 + $0xe0] sm:$0xff] }
  0x5e   :  { %2692 = vmatpush3.bf16.msra.mxu0 %v2691_v36  ;;  %4548 = vst [vmem:[#allocation23_spill] sm:$0xff] %v3451_v31  ;;  %4549 = vst [vmem:[#allocation24_spill] sm:$0xff] %v3453_v32  ;;  %v836_v36 = vld [vmem:[#allocation8 + $0xa8] sm:$0xff]  ;;  %v3477_v57 = vsub.f32 %v831_v20, %v881_v26  ;;  %v895_v2 = vand.u32 4294901760, %v840_v48  ;;  %v899_v3 = vand.u32 4294901760, %v842_v51  ;;  %v845_v20 = vld [vmem:[#allocation8 + $0xf0] sm:$0xff] }
  0x5f   :  { %2693 = vmatprep.subr.bf16.mxu0 %v3285_v0  ;;  %4551 = vst [vmem:[#allocation26_spill] sm:$0xff] %v3457_v34  ;;  %4552 = vst [vmem:[#allocation27_spill] sm:$0xff] %v3459_v35  ;;  %v887_v61 = vand.u32 4294901760, %v836_v36 }
  0x60   :  { %4556 = vst [vmem:[#allocation31_spill] sm:$0xff] %v3467_v46  ;;  %4559 = vst [vmem:[#allocation34_spill] sm:$0xff] %v3473_v54  ;;  %v3497_v19 = vpack.c.bf16 %v899_v3, %v895_v2 }
  0x61   :  { %2635 = vmatmul.mubr.f32.vlgmr.msra.gmra.mrb[0].mxu0 %v152_v17  ;;  %4561 = vst [vmem:[#allocation36_spill] sm:$0xff] %v3477_v57 }
  0x62   :  { %2695 = vmatpush3.bf16.msra.mxu0 %v2694_v37  ;;  %2645 = vmatprep.mubr.msk.f32.mxu0 %vm3286_vm0, %v4373_v1  ;;  %v838_v37 = vld [vmem:[#allocation8 + $0xb8] sm:$0xff]  ;;  %4569 = vst [vmem:[#allocation44_spill] sm:$0xff] %v3497_v19 }
  0x63   :  { %2696 = vmatprep.subr.bf16.mxu0 %v3285_v0 }
  0x66   :  { %2698 = vmatpush3.bf16.msra.mxu0 %v2697_v38  ;;  %v835_v38 = vld [vmem:[#allocation8 + $0xa0] sm:$0xff] }
  0x67   :  { %2699 = vmatprep.subr.bf16.mxu0 %v3285_v0 }
  0x69   :  { %2646 = vmatmul.mubr.f32.vlgmr.msra.gmra.mrb[0].mxu0 %v153_v22 }
  0x6a   :  { %2701 = vmatpush3.bf16.msra.mxu0 %v2682_v12  ;;  %2656 = vmatprep.mubr.msk.f32.mxu0 %vm3286_vm0, %v4373_v1 }
  0x6b   :  { %2702 = vmatprep.subr.bf16.mxu0 %v3285_v0 }
  0x6e   :  { %2704 = vmatpush3.bf16.msra.mxu0 %v2685_v18 }
  0x6f   :  { %2705 = vmatprep.subr.bf16.mxu0 %v3285_v0 }
  0x71   :  { %2657 = vmatmul.mubr.f32.vlgmr.msra.gmra.mrb[0].mxu0 %v154_v27  ;;  %v885_v27 = vand.u32 4294901760, %v833_v21 }
  0x72   :  { %2707 = vmatpush3.bf16.msra.mxu0 %v2706_v39  ;;  %2667 = vmatprep.mubr.msk.f32.mxu0 %vm3286_vm0, %v4373_v1  ;;  %v3461_v39 = vsub.f32 %v828_v8, %v871_v10  ;;  %v3486_v8 = vsub.f32 %v836_v36, %v887_v61  ;;  %v897_v10 = vand.u32 4294901760, %v839_v56  ;;  %v786_v36 = vld [vmem:[#allocation7 + $0x18] sm:$0xff] }
  0x73   :  { %2708 = vmatprep.subr.bf16.mxu0 %v3285_v0  ;;  %v3475_v55 = vpack.c.bf16 %v885_v27, %v881_v26  ;;  %v3479_v58 = vsub.f32 %v833_v21, %v885_v27  ;;  %v784_v21 = vld [vmem:[#allocation7 + $0x8] sm:$0xff]  ;;  %v901_v26 = vand.u32 4294901760, %v841_v4 }
  0x74   :  { %4553 = vst [vmem:[#allocation28_spill] sm:$0xff] %v3461_v39  ;;  %4564 = vst [vmem:[#allocation39_spill] sm:$0xff] %v3486_v8  ;;  %v3504_v27 = vsub.f32 %v839_v56, %v897_v10 }
  0x75   :  { %4560 = vst [vmem:[#allocation35_spill] sm:$0xff] %v3475_v55  ;;  %4562 = vst [vmem:[#allocation37_spill] sm:$0xff] %v3479_v58 }
  0x76   :  { %2710 = vmatpush3.bf16.msra.mxu0 %v2709_v40  ;;  %v3463_v40 = vsub.f32 %v830_v9, %v875_v11  ;;  %v844_v11 = vld [vmem:[#allocation8 + $0xe8] sm:$0xff]  ;;  %4572 = vst [vmem:[#allocation47_spill] sm:$0xff] %v3504_v27 }
  0x77   :  { %2711 = vmatprep.subr.bf16.mxu0 %v3285_v0 }
  0x78   :  { %4554 = vst [vmem:[#allocation29_spill] sm:$0xff] %v3463_v40 }
  0x79   :  { %2668 = vmatmul.mubr.f32.vlgmr.msra.gmra.mrb[0].mxu0 %v152_v17 }
  0x7a   :  { %2713 = vmatpush3.bf16.msra.mxu0 %v2682_v12  ;;  %2678 = vmatprep.mubr.msk.f32.mxu0 %vm3286_vm0, %v4373_v1  ;;  %v827_v12 = vld [vmem:[#allocation8 + $0x60] sm:$0xff] }
  0x7b   :  { %2714 = vmatprep.subr.bf16.mxu0 %v3285_v0  ;;  %v867_v0 = vand.u32 4294901760, %v826_v62  ;;  %v873_v14 = vand.u32 4294901760, %v827_v12 }
  0x7d   :  { %v3425_v6 = vpack.c.bf16 %v867_v0, %v863_v63  ;;  %v3455_v33 = vsub.f32 %v826_v62, %v867_v0  ;;  %v3465_v45 = vsub.f32 %v827_v12, %v873_v14  ;;  %v891_v62 = vand.u32 4294901760, %v838_v37  ;;  %v846_v12 = vld [vmem:[#allocation8 + $0xf8] sm:$0xff] }
  0x7e   :  { %2716 = vmatpush3.bf16.msra.mxu0 %v2685_v18  ;;  %v832_v18 = vld [vmem:[#allocation8 + $0x88] sm:$0xff]  ;;  %v889_v63 = vand.u32 4294901760, %v835_v38  ;;  %v893_v0 = vand.u32 4294901760, %v837_v47 }
  0x7f   :  { %2718 = vmatprep.subr.bf16.mxu0 %v3409_v49  ;;  %4544 = vst [vmem:[#allocation19_spill] sm:$0xff] %v3425_v6  ;;  %2886 = vmatprep.subr.bf16.mxu1 %v3425_v6  ;;  %v879_v22 = vand.u32 4294901760, %v832_v18  ;;  %4550 = vst [vmem:[#allocation25_spill] sm:$0xff] %v3455_v33  ;;  %v3484_v5 = vpack.c.bf16 %v891_v62, %v887_v61  ;;  %v3488_v9 = vsub.f32 %v838_v37, %v891_v62 }
  0x80   :  { %2888 = vmatpush1.bf16.msra.mxu1 %v3427_v7  ;;  %4555 = vst [vmem:[#allocation30_spill] sm:$0xff] %v3465_v45  ;;  %v903_v37 = vand.u32 4294901760, %v844_v11  ;;  %v3508_v61 = vpack.c.bf16 %v901_v26, %v897_v10  ;;  %v3510_v62 = vsub.f32 %v841_v4, %v901_v26  ;;  %v3530_v10 = vsub.f32 %v3399_v41, %v847_v43 }
  0x81   :  { %2679 = vmatmul.mubr.f32.vlgmr.msra.gmra.mrb[0].mxu0 %v152_v17  ;;  %v3435_v17 = vpack.c.bf16 %v877_v15, %v873_v14  ;;  %2890 = vmatprep.subr.bf16.mxu1 %v3433_v16  ;;  %v3469_v52 = vpack.c.bf16 %v883_v23, %v879_v22  ;;  %v3471_v53 = vsub.f32 %v832_v18, %v879_v22  ;;  %v4383_v26 = vand.u32 4294901760, %v3443_v25 }
  0x82   :  { %943 = vmatprep.mubr.f32.mxu0 %v4373_v1  ;;  %2720 = vmatpush1.bf16.msra.mxu0 %v3411_v50  ;;  %4563 = vst [vmem:[#allocation38_spill] sm:$0xff] %v3484_v5  ;;  %4565 = vst [vmem:[#allocation40_spill] sm:$0xff] %v3488_v9  ;;  %v3491_v14 = vpack.c.bf16 %v893_v0, %v889_v63  ;;  %v3493_v15 = vsub.f32 %v835_v38, %v889_v63  ;;  %v907_v38 = vand.u32 4294901760, %v846_v12 }
  0x83   :  { %2722 = vmatprep.subr.bf16.mxu0 %v3417_v59  ;;  %4547 = vst [vmem:[#allocation22_spill] sm:$0xff] %v3435_v17  ;;  %4557 = vst [vmem:[#allocation32_spill] sm:$0xff] %v3469_v52  ;;  %v3495_v18 = vsub.f32 %v837_v47, %v893_v0  ;;  %v3500_v22 = vsub.f32 %v840_v48, %v895_v2  ;;  %v3502_v23 = vsub.f32 %v842_v51, %v899_v3 }
  0x84   :  { %2892 = vmatpush1.bf16.msra.mxu1 %v3435_v17  ;;  %4558 = vst [vmem:[#allocation33_spill] sm:$0xff] %v3471_v53  ;;  %4566 = vst [vmem:[#allocation41_spill] sm:$0xff] %v3491_v14  ;;  %v905_v47 = vand.u32 4294901760, %v843_v13  ;;  %v909_v48 = vand.u32 4294901760, %v845_v20  ;;  %v1702_v51 = vand.u32 4294901760, %v784_v21  ;;  %v3514_v56 = vpack.c.bf16 %v907_v38, %v903_v37 }
  0x85   :  { %2894 = vmatprep.subr.bf16.mxu1 %v3469_v52  ;;  %4567 = vst [vmem:[#allocation42_spill] sm:$0xff] %v3493_v15  ;;  %4568 = vst [vmem:[#allocation43_spill] sm:$0xff] %v3495_v18  ;;  %v3516_v63 = vsub.f32 %v844_v11, %v903_v37  ;;  %v3518_v0 = vsub.f32 %v846_v12, %v907_v38  ;;  %v1706_v2 = vand.u32 4294901760, %v786_v36  ;;  %v4375_v41 = vand.u32 4294901760, %v3530_v10 }
  0x86   :  { %2724 = vmatpush1.bf16.msra.mxu0 %v3419_v60  ;;  %4570 = vst [vmem:[#allocation45_spill] sm:$0xff] %v3500_v22  ;;  %4571 = vst [vmem:[#allocation46_spill] sm:$0xff] %v3502_v23  ;;  %v3520_v3 = vsub.f32 %v843_v13, %v905_v47  ;;  %v3522_v1 = vsub.f32 %v845_v20, %v909_v48  ;;  %v3525_v4 = vsub.f32 %v784_v21, %v1702_v51 }
  0x87   :  { %2726 = vmatprep.subr.bf16.mxu0 %v3425_v6  ;;  %4573 = vst [vmem:[#allocation48_spill] sm:$0xff] %v3508_v61  ;;  %4574 = vst [vmem:[#allocation49_spill] sm:$0xff] %v3510_v62  ;;  %v3535_v11 = vsub.f32 %v3401_v42, %v851_v44  ;;  %v3537_v12 = vsub.f32 %v786_v36, %v1706_v2  ;;  %v3540_v13 = vpack.c.bf16 %v909_v48, %v905_v47 }
  0x88   :  { %2896 = vmatpush1.bf16.msra.mxu1 %v3475_v55  ;;  %4575 = vst [vmem:[#allocation50_spill] sm:$0xff] %v3514_v56  ;;  %4576 = vst [vmem:[#allocation51_spill] sm:$0xff] %v3516_v63  ;;  %v3544_v20 = vpack.c.bf16 %v1706_v2, %v1702_v51  ;;  %v958_v42 = vsub.f32 %v3530_v10, %v4375_v41  ;;  %v4378_v21 = vand.u32 4294901760, %v3441_v24  ;;  %v4381_v37 = vand.u32 4294901760, %v3445_v28 }
  0x89   :  { %2898 = vmatprep.subr.bf16.mxu1 %v3484_v5  ;;  %4577 = vst [vmem:[#allocation52_spill] sm:$0xff] %v3518_v0  ;;  %4578 = vst [vmem:[#allocation53_spill] sm:$0xff] %v3520_v3  ;;  %v4376_v43 = vand.u32 4294901760, %v3535_v11  ;;  %v976_v48 = vsub.f32 %v3443_v25, %v4383_v26  ;;  %v4391_v26 = vand.u32 4294901760, %v3459_v35  ;;  %v4422_v49 = vand.u32 4294901760, %v3516_v63 }
  0x8a   :  { %2728 = vmatpush1.bf16.msra.mxu0 %v3427_v7  ;;  %4579 = vst [vmem:[#allocation54_spill] sm:$0xff] %v3522_v1  ;;  %4580 = vst [vmem:[#allocation55_spill] sm:$0xff] %v3525_v4  ;;  %v959_v36 = vand.u32 4294901760, %v958_v42  ;;  %v964_v47 = vsub.f32 %v3441_v24, %v4378_v21  ;;  %v4380_v42 = vand.u32 4294901760, %v3447_v29 }
  0x8b   :  { %2730 = vmatprep.subr.bf16.mxu0 %v3433_v16  ;;  %4581 = vst [vmem:[#allocation56_spill] sm:$0xff] %v3530_v10  ;;  %4582 = vst [vmem:[#allocation57_spill] sm:$0xff] %v3535_v11  ;;  %v970_v44 = vsub.f32 %v3535_v11, %v4376_v43  ;;  %v977_v41 = vand.u32 4294901760, %v976_v48  ;;  %v982_v43 = vsub.f32 %v3445_v28, %v4381_v37  ;;  %v3293_v11 = vmov 1326507024  }
  0x8c   :  { %2900 = vmatpush1.bf16.msra.mxu1 %v3491_v14  ;;  %4583 = vst [vmem:[#allocation58_spill] sm:$0xff] %v3537_v12  ;;  %4584 = vst [vmem:[#allocation59_spill] sm:$0xff] %v3540_v13  ;;  %v965_v2 = vand.u32 4294901760, %v964_v47  ;;  %v994_v21 = vsub.f32 %v3447_v29, %v4380_v42  ;;  %v4389_v47 = vand.u32 4294901760, %v3453_v32 }
  0x8d   :  { %2902 = vmatprep.subr.bf16.mxu1 %v3497_v19  ;;  %4585 = vst [vmem:[#allocation60_spill] sm:$0xff] %v3544_v20  ;;  %v971_v38 = vand.u32 4294901760, %v970_v44  ;;  %v983_v44 = vand.u32 4294901760, %v982_v43  ;;  %v4388_v43 = vand.u32 4294901760, %v3455_v33 }
  0x8e   :  { %2732 = vmatpush1.bf16.msra.mxu0 %v3435_v17 }
  0x8f   :  { %2734 = vmatprep.subr.bf16.mxu0 %v3469_v52  ;;  %v2749_v51 = vpack.c.bf16 %v971_v38, %v959_v36  ;;  %v4385_v36 = vand.u32 4294901760, %v3451_v31  ;;  %v995_v38 = vand.u32 4294901760, %v994_v21  ;;  %v1006_v21 = vsub.f32 %v3453_v32, %v4389_v47 }
  0x90   :  { %2904 = vmatpush1.bf16.msra.mxu1 %v3508_v61  ;;  %v1018_v37 = vsub.f32 %v3455_v33, %v4388_v43  ;;  %v4404_v52 = vand.u32 4294901760, %v3488_v9 }
  0x91   :  { %2906 = vmatprep.subr.bf16.mxu1 %v3514_v56 }
  0x92   :  { %2736 = vmatpush1.bf16.msra.mxu0 %v3475_v55 }
  0x93   :  { %2738 = vmatprep.subr.bf16.mxu0 %v3484_v5 }
  0x94   :  { %2908 = vmatpush1.bf16.msra.mxu1 %v3540_v13 }
  0x95   :  { %2910 = vmatprep.subr.bf16.mxu1 %v3544_v20  ;;  %v1019_v20 = vand.u32 4294901760, %v1018_v37 }
  0x96   :  { %2740 = vmatpush1.bf16.msra.mxu0 %v3491_v14 }
  0x97   :  { %2742 = vmatprep.subr.bf16.mxu0 %v3497_v19  ;;  %v4393_v19 = vand.u32 4294901760, %v3463_v40 }
  0x9a   :  { %2744 = vmatpush1.bf16.msra.mxu0 %v3508_v61 }
  0x9b   :  { %2746 = vmatprep.subr.bf16.mxu0 %v3514_v56  ;;  %v4382_v56 = vand.u32 4294901760, %v3449_v30 }
  0x9d   :  { %v988_v48 = vsub.f32 %v3449_v30, %v4382_v56  ;;  %v4394_v56 = vand.u32 4294901760, %v3457_v34 }
  0x9e   :  { %2748 = vmatpush1.bf16.msra.mxu0 %v3540_v13  ;;  %v3571_v13 = vpack.c.bf16 %v977_v41, %v965_v2  ;;  %v1000_v41 = vsub.f32 %v3451_v31, %v4385_v36  ;;  %v1007_v36 = vand.u32 4294901760, %v1006_v21  ;;  %v4395_v21 = vand.u32 4294901760, %v3465_v45 }
  0x9f   :  { %2750 = vmatprep.subr.bf16.mxu0 %v2749_v51  ;;  %v3586_v51 = vpack.c.bf16 %v995_v38, %v983_v44  ;;  %v989_v2 = vand.u32 4294901760, %v988_v48  ;;  %v1012_v44 = vsub.f32 %v3457_v34, %v4394_v56  ;;  %v1024_v38 = vsub.f32 %v3459_v35, %v4391_v26 }
  0xa0   :  { %4586 = vst [vmem:[#allocation61_spill] sm:$0xff] %v3571_v13  ;;  %v1001_v42 = vand.u32 4294901760, %v1000_v41  ;;  %v3604_v48 = vpack.c.bf16 %v1019_v20, %v1007_v36  ;;  %v4392_v41 = vand.u32 4294901760, %v3461_v39  ;;  %v4396_v36 = vand.u32 4294901760, %v3467_v46 }
  0xa1   :  { %4587 = vst [vmem:[#allocation62_spill] sm:$0xff] %v3586_v51  ;;  %v1013_v43 = vand.u32 4294901760, %v1012_v44  ;;  %v1025_v47 = vand.u32 4294901760, %v1024_v38  ;;  %v1036_v44 = vsub.f32 %v3465_v45, %v4395_v21  ;;  %v4406_v21 = vand.u32 4294901760, %v3477_v57  ;;  %v809_v45 = vld [vmem:[#allocation7 + $0xd0] sm:$0xff] }
  0xa2   :  { %v3596_v61 = vpack.c.bf16 %v1001_v42, %v989_v2  ;;  %4589 = vst [vmem:[#allocation64_spill] sm:$0xff] %v3604_v48  ;;  %v1030_v37 = vsub.f32 %v3461_v39, %v4392_v41  ;;  %v1042_v2 = vsub.f32 %v3463_v40, %v4393_v19  ;;  %v1048_v38 = vsub.f32 %v3467_v46, %v4396_v36 }
  0xa3   :  { %v3611_v42 = vpack.c.bf16 %v1025_v47, %v1013_v43  ;;  %v4401_v47 = vand.u32 4294901760, %v3471_v53  ;;  %v4400_v43 = vand.u32 4294901760, %v3473_v54  ;;  %v1037_v19 = vand.u32 4294901760, %v1036_v44 }
  0xa4   :  { %4588 = vst [vmem:[#allocation63_spill] sm:$0xff] %v3596_v61  ;;  %v1031_v20 = vand.u32 4294901760, %v1030_v37  ;;  %v1043_v26 = vand.u32 4294901760, %v1042_v2  ;;  %v1049_v56 = vand.u32 4294901760, %v1048_v38  ;;  %v4403_v36 = vand.u32 4294901760, %v3479_v58 }
  0xa5   :  { %4590 = vst [vmem:[#allocation65_spill] sm:$0xff] %v3611_v42  ;;  %v1054_v37 = vsub.f32 %v3471_v53, %v4401_v47  ;;  %v1066_v2 = vsub.f32 %v3473_v54, %v4400_v43  ;;  %v4405_v38 = vand.u32 4294901760, %v3486_v8  ;;  %v807_v54 = vld [vmem:[#allocation7 + $0xc0] sm:$0xff]  ;;  %v1756_v46 = vand.u32 4294901760, %v809_v45 }
  0xa6   :  { %v3626_v41 = vpack.c.bf16 %v1043_v26, %v1031_v20  ;;  %v3636_v14 = vpack.c.bf16 %v1049_v56, %v1037_v19  ;;  %v1060_v26 = vsub.f32 %v3477_v57, %v4406_v21  ;;  %v1072_v20 = vsub.f32 %v3479_v58, %v4403_v36 }
  0xa7   :  { %v1055_v5 = vand.u32 4294901760, %v1054_v37  ;;  %v1067_v55 = vand.u32 4294901760, %v1066_v2  ;;  %v1078_v19 = vsub.f32 %v3486_v8, %v4405_v38  ;;  %v1090_v37 = vsub.f32 %v3488_v9, %v4404_v52 }
  0xa8   :  { %4591 = vst [vmem:[#allocation66_spill] sm:$0xff] %v3626_v41  ;;  %4592 = vst [vmem:[#allocation67_spill] sm:$0xff] %v3636_v14  ;;  %v1061_v43 = vand.u32 4294901760, %v1060_v26  ;;  %v1073_v47 = vand.u32 4294901760, %v1072_v20  ;;  %v4407_v2 = vand.u32 4294901760, %v3493_v15  ;;  %v4416_v52 = vand.u32 4294901760, %v3525_v4 }
  0xa9   :  { %v3644_v44 = vpack.c.bf16 %v1067_v55, %v1055_v5  ;;  %v1079_v55 = vand.u32 4294901760, %v1078_v19  ;;  %v4408_v5 = vand.u32 4294901760, %v3495_v18  ;;  %v1091_v36 = vand.u32 4294901760, %v1090_v37  ;;  %v2576_v37 = vld [vmem:[%s4368_s1] ss:$0 sm:$0xff]  ;;  %s3294_s1 = smov [#allocation10]  }
  0xaa   :  { %v3651_v56 = vpack.c.bf16 %v1073_v47, %v1061_v43  ;;  %v1084_v26 = vsub.f32 %v3493_v15, %v4407_v2  ;;  %v4413_v47 = vand.u32 4294901760, %v3500_v22  ;;  %v4415_v43 = vand.u32 4294901760, %v3502_v23  ;;  %s2565_s2 = sshll.u32 %s3294_s1, 4  ;;  %s2566_s2 = int_to_ptr.vmem [resolvable:$true] %s2565_s2 }
  0xab   :  { %4593 = vst [vmem:[#allocation68_spill] sm:$0xff] %v3644_v44  ;;  %v1096_v20 = vsub.f32 %v3495_v18, %v4408_v5  ;;  %v3667_v38 = vpack.c.bf16 %v1091_v36, %v1079_v55  ;;  %v1813_v17 = vsub.f32 %v3525_v4, %v4416_v52  ;;  %v4419_v36 = vand.u32 4294901760, %v3537_v12  ;;  %s3247_s18 = scalar_lea.vmem %s2566_s2, 256  ;;  %p3252_p5 = scmp.lt.s32.totalorder %s2566_s2, %s2566_s2 }
  0xac   :  { %4594 = vst [vmem:[#allocation69_spill] sm:$0xff] %v3651_v56  ;;  %v1085_v19 = vand.u32 4294901760, %v1084_v26  ;;  %v1102_v2 = vsub.f32 %v3500_v22, %v4413_v47  ;;  %v1114_v5 = vsub.f32 %v3502_v23, %v4415_v43  ;;  %v4423_v55 = vand.u32 4294901760, %v3504_v27  ;;  %v4639_v32 = vld [vmem:[#allocation65_spill] sm:$0xff]  ;;  %p3248_p4 = scmp.ne.s32.totalorder %s2566_s2, %s3247_s18  ;;  %p3253_p6 = scmp.lt.s32.totalorder %s3247_s18, %s3247_s18 }
  0xad   :  { %4595 = vst [vmem:[#allocation70_spill] sm:$0xff] %v3667_v38  ;;  %v1097_v21 = vand.u32 4294901760, %v1096_v20  ;;  %v4421_v26 = vand.u32 4294901760, %v3510_v62  ;;  %v1825_v43 = vsub.f32 %v3537_v12, %v4419_v36  ;;  %v1814_v50 = vand.u32 4294901760, %v1813_v17 }
  0xae   :  { %v1103_v7 = vand.u32 4294901760, %v1102_v2  ;;  %v1115_v6 = vand.u32 4294901760, %v1114_v5  ;;  %v1108_v52 = vsub.f32 %v3504_v27, %v4423_v55  ;;  %v3291_v38 = vmov 2102212464   ;;  %v796_v27 = vld [vmem:[#allocation7 + $0x68] sm:$0xff]  ;;  %p3254_p7 = por %p3253_p6, %p3252_p5 }
  0xaf   :  { %v3684_v20 = vpack.c.bf16 %v1097_v21, %v1085_v19  ;;  %v1120_v21 = vsub.f32 %v3510_v62, %v4421_v26  ;;  %v1126_v26 = vsub.f32 %v3516_v63, %v4422_v49  ;;  %v798_v62 = vld [vmem:[#allocation7 + $0x78] sm:$0xff] }
  0xb0   :  { %v3694_v59 = vpack.c.bf16 %v1115_v6, %v1103_v7  ;;  %v1109_v5 = vand.u32 4294901760, %v1108_v52  ;;  %v4424_v6 = vand.u32 4294901760, %v3518_v0  ;;  %p3255_p8 = pnand %p3254_p7, %p3248_p4 }
  0xb1   :  { %4596 = vst [vmem:[#allocation71_spill] sm:$0xff] %v3684_v20 }
  0xb2   :  { %4598 = vst [vmem:[#allocation73_spill] sm:$0xff] %v3694_v59  ;;  %v1138_v52 = vsub.f32 %v3518_v0, %v4424_v6  ;;  %v3290_v59 = vmov 2131351028   ;;  %v3292_v6 = vmov 920167782  }
 0x154   :  { %v564_v16 = vpop.f32.mrb[0].mxu0 }
 0x155   :  { %v3686_v47 = vmul.f32 %v2576_v37, %v564_v16  ;;  %v2680_v60 = vpop.f32.mrb[1].mxu0  ;;  %v1826_v16 = vand.u32 4294901760, %v1825_v43 }
 0x156   :  { %v1121_v60 = vand.u32 4294901760, %v1120_v21  ;;  %v1127_v21 = vand.u32 4294901760, %v1126_v26 }
 0x157   :  { %4597 = vst [vmem:[#allocation72_spill] sm:$0xff] %v3686_v47  ;;  %v579_v2 = vand.u32 2139095040, %v3686_v47  ;;  %v3700_v37 = vpack.c.bf16 %v1826_v16, %v1814_v50  ;;  %v4425_v7 = vand.u32 2147483647, %v3686_v47  ;;  %v4426_v50 = vand.u32 4294901760, %v3520_v3 }
 0x158   :  { %v3702_v36 = vpack.c.bf16 %v1121_v60, %v1109_v5  ;;  %v4431_v5 = vand.u32 4294901760, %v3522_v1 }
 0x159   :  { %v580_v19 = vshrl.u32 %v579_v2, 23  ;;  %4599 = vst [vmem:[#allocation74_spill] sm:$0xff] %v3700_v37  ;;  %v1139_v2 = vand.u32 4294901760, %v1138_v52  ;;  %v583_v16 = vand.u32 8388607, %v4425_v7  ;;  %v1132_v49 = vsub.f32 %v3520_v3, %v4426_v50 }
 0x15a   :  { %4600 = vst [vmem:[#allocation75_spill] sm:$0xff] %v3702_v36  ;;  %v1144_v52 = vsub.f32 %v3522_v1, %v4431_v5  ;;  %v3288_v36 = vmov 683565275  }
 0x15b   :  { %v2577_v17 = vadd.s32 4294967169, %v580_v19  ;;  %v3717_v19 = vpack.c.bf16 %v1139_v2, %v1127_v21  ;;  %v1133_v2 = vand.u32 4294901760, %v1132_v49 }
 0x15c   :  { %v1145_v42 = vand.u32 4294901760, %v1144_v52 }
 0x15d   :  { %v586_v43 = vadd.s32 1, %v2577_v17  ;;  %4601 = vst [vmem:[#allocation76_spill] sm:$0xff] %v3717_v19  ;;  %v584_v17 = vor.u32 8388608, %v583_v16 }
 0x15e   :  { %v3727_v47 = vpack.c.bf16 %v1145_v42, %v1133_v2 }
 0x15f   :  { %vm587_vm2 = vcmp.gt.s32.totalorder %v586_v43, 0 }
 0x160   :  { %v588_v60 = vsel %vm587_vm2, %v586_v43, 0  ;;  %v3289_v43 = vmov 2475754826  }
 0x161   :  { %v590_v55 = vand.u32 31, %v588_v60  ;;  %v589_v7 = vshrl.u32 %v588_v60, 5 }
 0x163   :  { %v591_v26 = vsub.s32 32, %v590_v55  ;;  %v593_v37 = vshll.u32 %v3288_v36, %v590_v55  ;;  %v596_v21 = vshll.u32 %v3289_v43, %v590_v55  ;;  %v599_v50 = vshll.u32 %v3290_v59, %v590_v55 }
 0x164   :  { %v602_v44 = vshll.u32 %v3291_v38, %v590_v55  ;;  %v605_v10 = vshll.u32 %v3292_v6, %v590_v55  ;;  %vm608_vm3 = vcmp.lt.s32.totalorder %v589_v7, 1  ;;  %vm611_vm4 = vcmp.lt.s32.totalorder %v589_v7, 4 }
 0x165   :  { %v594_v19 = vshrl.u32 %v3289_v43, %v591_v26  ;;  %v597_v20 = vshrl.u32 %v3290_v59, %v591_v26  ;;  %v600_v56 = vshrl.u32 %v3291_v38, %v591_v26  ;;  %v603_v16 = vshrl.u32 %v3292_v6, %v591_v26 }
 0x166   :  { %v606_v14 = vshrl.u32 %v3293_v11, %v591_v26  ;;  %v592_v49 = vshrl.u32 %v3288_v36, %v591_v26  ;;  %vm610_vm5 = vcmp.lt.s32.totalorder %v589_v7, 3  ;;  %vm609_vm6 = vcmp.lt.s32.totalorder %v589_v7, 2  ;;  %v791_v26 = vld [vmem:[#allocation7 + $0x40] sm:$0xff] }
 0x167   :  { %v595_v41 = vor.u32 %v594_v19, %v593_v37  ;;  %v598_v5 = vor.u32 %v597_v20, %v596_v21  ;;  %v601_v60 = vor.u32 %v600_v56, %v599_v50  ;;  %v604_v48 = vor.u32 %v603_v16, %v602_v44 }
 0x168   :  { %v607_v61 = vor.u32 %v606_v14, %v605_v10  ;;  %v624_v37 = vshll.u32 %v584_v17, 8  ;;  %v1720_v63 = vand.u32 4294901760, %v791_v26 }
 0x169   :  { %v613_v43 = vsel %vm611_vm4, %v601_v60, 2102212464  ;;  %v616_v51 = vsel %vm608_vm3, %v595_v41, %v598_v5  ;;  %v620_v59 = vsel %vm608_vm3, %v598_v5, %v601_v60  ;;  %v617_v13 = vsel %vm611_vm4, %v604_v48, 920167782 }
 0x16a   :  { %v621_v38 = vsel %vm611_vm4, %v607_v61, 1326507024  ;;  %v618_v55 = vsel %vm610_vm5, %v601_v60, %v617_v13  ;;  %v612_v20 = vsel %vm608_vm3, %v592_v49, %v595_v41  ;;  %v614_v56 = vsel %vm610_vm5, %v598_v5, %v613_v43  ;;  %v794_v60 = vld [vmem:[#allocation7 + $0x58] sm:$0xff]  ;;  %v793_v5 = vld [vmem:[#allocation7 + $0x50] sm:$0xff] }
 0x16b   :  { %v622_v11 = vsel %vm610_vm5, %v604_v48, %v621_v38  ;;  %v619_v6 = vsel %vm609_vm6, %v616_v51, %v618_v55  ;;  %v615_v61 = vsel %vm609_vm6, %v612_v20, %v614_v56  ;;  %v1722_v19 = vand.u32 4294901760, %v794_v60 }
 0x16c   :  { %v623_v44 = vsel %vm609_vm6, %v620_v59, %v622_v11  ;;  %v3732_v36 = vmul.u32.u64.low %v624_v37, %v619_v6  ;;  %v3733_v50 = vmul.u32.u64.high %v624_v37, %v619_v6, %v3732_v36  ;;  %v631_v48 = vmul.u32 %v624_v37, %v615_v61 }
 0x16d   :  { %v3729_v14 = vmul.u32.u64.low %v624_v37, %v623_v44  ;;  %v3730_v10 = vmul.u32.u64.high %v624_v37, %v623_v44, %v3729_v14  ;;  %v792_v37 = vld [vmem:[#allocation7 + $0x48] sm:$0xff]  ;;  %v1724_v0 = vand.u32 4294901760, %v793_v5 }
 0x16e   :  { %v634_v51 = vadd.s32 1, %v3733_v50 }
 0x16f   :  { %vm633_vm7 = vc.u32 %v3730_v10, %v3732_v36  ;;  %v632_v56 = vadd.s32 %v3732_v36, %v3730_v10  ;;  %v785_v36 = vld [vmem:[#allocation7 + $0x10] sm:$0xff] }
 0x170   :  { %v635_v41 = vsel %vm633_vm7, %v634_v51, %v3733_v50  ;;  %v789_v51 = vld [vmem:[#allocation7 + $0x30] sm:$0xff] }
 0x171   :  { %v636_v7 = vadd.s32 %v635_v41, %v631_v48  ;;  %v1716_v11 = vand.u32 4294901760, %v789_v51 }
 0x173   :  { %v637_v17 = vadd.s32 536870912, %v636_v7 }
 0x175   :  { %v638_v52 = vshrl.u32 %v637_v17, 30 }
 0x177   :  { %v639_v2 = vshll.u32 %v638_v52, 30 }
 0x179   :  { %v640_v16 = vsub.s32 %v636_v7, %v639_v2  ;;  %v787_v7 = vld [vmem:[#allocation7 + $0x20] sm:$0xff] }
 0x17b   :  { %v642_v49 = vsub.s32 0, %v640_v16 }
 0x17d   :  { %v2578_v59 = vmin.u32 %v642_v49, %v640_v16 }
 0x17f   :  { %v644_v38 = vclz %v2578_v59 }
 0x181   :  { %v2579_v55 = vadd.s32 4294967294, %v644_v38 }
 0x183   :  { %vm2580_vm8 = vcmp.lt.s32.totalorder %v2579_v55, 0 }
 0x184   :  { %v647_v20 = vsel %vm2580_vm8, 0, %v2579_v55  ;;  %v662_v55 = vsub.s32 4, %v638_v52 }
 0x185   :  { %v648_v6 = vsub.s32 32, %v647_v20  ;;  %v652_v44 = vsub.s32 4294967266, %v647_v20  ;;  %v649_v14 = vshll.u32 %v640_v16, %v647_v20 }
 0x187   :  { %v650_v50 = vshrl.u32 %v632_v56, %v648_v6  ;;  %v653_v61 = vadd.s32 127, %v652_v44  ;;  %v4602_v56 = vld [vmem:[#allocation72_spill] sm:$0xff] }
 0x188   :  { %vm578_vm9 = vcmp.lt.s32.totalorder %v4602_v56, 0  ;;  %v4603_v6 = vand.u32 2147483647, %v4602_v56  ;;  %vm668_vm1 = vweird.f32 %v4602_v56 }
 0x189   :  { %v651_v48 = vor.u32 %v650_v50, %v649_v14  ;;  %v654_v41 = vshll.u32 %v653_v61, 23  ;;  %v663_v14 = vsel %vm578_vm9, %v662_v55, %v638_v52 }
 0x18a   :  { %vm577_vm10 = vcmp.le.f32.partialorder %v4603_v6, 0.7853982 }
 0x18b   :  { %v655_v10 = vor.u32 4788187, %v654_v41  ;;  %v658_v59 = vcvt.s32.f32 %v651_v48  ;;  %v665_v61 = vsel %vm577_vm10, 0, %v663_v14  ;;  %v783_v41 = vld [vmem:[#allocation7] sm:$0xff]  ;;  %v1708_v48 = vand.u32 4294901760, %v785_v36 }
 0x18c   :  { %v669_v16 = vadd.s32 3, %v665_v61  ;;  %v773_v17 = vand.u32 3, %v665_v61 }
 0x18d   :  { %v656_v49 = vand.u32 2147483647, %v655_v10  ;;  %v1704_v10 = vand.u32 4294901760, %v783_v41 }
 0x18e   :  { %v670_v2 = vand.u32 3, %v669_v16  ;;  %vm778_vm12 = vcmp.eq.s32.totalorder %v773_v17, 2  ;;  %v1718_v16 = vand.u32 4294901760, %v792_v37  ;;  %vm775_vm14 = vcmp.eq.s32.totalorder %v773_v17, 0 }
 0x18f   :  { %v659_v38 = vmul.f32 %v658_v59, %v656_v49  ;;  %v788_v49 = vld [vmem:[#allocation7 + $0x28] sm:$0xff]  ;;  %v790_v59 = vld [vmem:[#allocation7 + $0x38] sm:$0xff]  ;;  %v3777_v14 = vsub.f32 %v783_v41, %v1704_v10  ;;  %vm774_vm0 = vcmp.lt.s32.totalorder %v773_v17, 2 }
 0x190   :  { %v1710_v52 = vand.u32 4294901760, %v788_v49  ;;  %v1714_v55 = vand.u32 4294901760, %v790_v59  ;;  %vm675_vm11 = vcmp.eq.s32.totalorder %v670_v2, 2  ;;  %vm672_vm13 = vcmp.eq.s32.totalorder %v670_v2, 0 }
 0x191   :  { %v660_v20 = vxor.u32 2147483648, %v659_v38  ;;  %vm671_vm15 = vcmp.lt.s32.totalorder %v670_v2, 2 }
 0x192   :  { %v3786_v2 = vpack.c.bf16 %v1714_v55, %v1710_v52  ;;  %v3788_v17 = vsub.f32 %v788_v49, %v1710_v52  ;;  %v1730_v49 = vand.u32 4294901760, %v798_v62  ;;  %v800_v52 = vld [vmem:[#allocation7 + $0x88] sm:$0xff] }
 0x193   :  { %v661_v44 = vsel %vm578_vm9, %v660_v20, %v659_v38  ;;  %v3775_v38 = vpack.c.bf16 %v1708_v48, %v1704_v10  ;;  %v1734_v23 = vand.u32 4294901760, %v800_v52 }
 0x194   :  { %v664_v50 = vsel %vm577_vm10, %v4602_v56, %v661_v44  ;;  %4606 = vst [vmem:[#allocation78_spill] sm:$0xff] %v3786_v2  ;;  %v795_v56 = vld [vmem:[#allocation7 + $0x60] sm:$0xff]  ;;  %v3833_v58 = vsub.f32 %v798_v62, %v1730_v49 }
 0x195   :  { %3155 = vcosq.f32 %v664_v50  ;;  %4604 = vst [vmem:[#allocation72_spill] sm:$0xff] %v3775_v38  ;;  %v1728_v12 = vand.u32 4294901760, %v795_v56  ;;  %v3843_v8 = vsub.f32 %v800_v52, %v1734_v23 }
 0x196   :  { %3157 = vsinq.f32 %v664_v50  ;;  %v1712_v50 = vand.u32 4294901760, %v787_v7  ;;  %4617 = vst [vmem:[#allocation88_spill] sm:$0xff] %v3833_v58 }
 0x19f   :  { %v3156_v6 = vpop.eup %3155 }
 0x1a0   :  { %v3158_v20 = vpop.eup %3157  ;;  %v676_v44 = vxor.u32 2147483648, %v3156_v6 }
 0x1a1   :  { %v673_v43 = vxor.u32 2147483648, %v3158_v20 }
 0x1a2   :  { %v677_v61 = vsel %vm675_vm11, %v676_v44, %v3158_v20  ;;  %v780_v21 = vsel %vm778_vm12, %v676_v44, %v3158_v20  ;;  %v3784_v20 = vsub.f32 %v785_v36, %v1708_v48  ;;  %v3802_v36 = vpack.c.bf16 %v1722_v19, %v1718_v16 }
 0x1a3   :  { %v674_v13 = vsel %vm672_vm13, %v3156_v6, %v673_v43  ;;  %v777_v42 = vsel %vm775_vm14, %v3156_v6, %v673_v43  ;;  %v3790_v43 = vsub.f32 %v790_v59, %v1714_v55  ;;  %v797_v6 = vld [vmem:[#allocation7 + $0x70] sm:$0xff]  ;;  %v1726_v48 = vand.u32 4294901760, %v796_v27  ;;  %v802_v59 = vld [vmem:[#allocation7 + $0x98] sm:$0xff] }
 0x1a4   :  { %v678_v41 = vsel %vm671_vm15, %v674_v13, %v677_v61  ;;  %v781_v10 = vsel %vm774_vm0, %v777_v42, %v780_v21  ;;  %v3792_v13 = vpack.c.bf16 %v1716_v11, %v1712_v50  ;;  %v3794_v42 = vsub.f32 %v787_v7, %v1712_v50  ;;  %4611 = vst [vmem:[#allocation83_spill] sm:$0xff] %v3802_v36  ;;  %v801_v50 = vld [vmem:[#allocation7 + $0x90] sm:$0xff] }
 0x1a5   :  { %v3780_v3 = vsel %vm668_vm1, nan, %v678_v41  ;;  %v782_v1 = vsel %vm668_vm1, nan, %v781_v10  ;;  %4607 = vst [vmem:[#allocation79_spill] sm:$0xff] %v3790_v43  ;;  %v3796_v21 = vsub.f32 %v789_v51, %v1716_v11  ;;  %v3805_v55 = vsub.f32 %v792_v37, %v1718_v16  ;;  %v799_v51 = vld [vmem:[#allocation7 + $0x80] sm:$0xff]  ;;  %v3818_v37 = vld [vmem:[#allocation7 + $0xb8] sm:$0xff] }
 0x1a6   :  { %v3782_v4 = vand.u32 4294901760, %v782_v1  ;;  %4608 = vst [vmem:[#allocation80_spill] sm:$0xff] %v3792_v13  ;;  %v3807_v7 = vsub.f32 %v794_v60, %v1722_v19  ;;  %v3809_v11 = vpack.c.bf16 %v1724_v0, %v1720_v63  ;;  %v4615_v61 = vmov 0.0   ;;  %v803_v19 = vld [vmem:[#allocation7 + $0xa0] sm:$0xff]  ;;  %v805_v60 = vld [vmem:[#allocation7 + $0xb0] sm:$0xff] }
 0x1a7   :  { %4609 = vst [vmem:[#allocation81_spill] sm:$0xff] %v3796_v21  ;;  %4612 = vst [vmem:[#allocation84_spill] sm:$0xff] %v3805_v55  ;;  %v3816_v10 = vsub.f32 %v791_v26, %v1720_v63  ;;  %v3820_v16 = vsub.f32 %v793_v5, %v1724_v0  ;;  %v3822_v22 = vsub.f32 %v796_v27, %v1726_v48  ;;  %v1738_v15 = vand.u32 4294901760, %v802_v59  ;;  %v808_v27 = vld [vmem:[#allocation7 + $0xc8] sm:$0xff] }
 0x1a8   :  { %4605 = vst [vmem:[#allocation77_spill] sm:$0xff] %v3782_v4  ;;  %v3799_v44 = vsub.f32 %v782_v1, %v3782_v4  ;;  %1696 = vmatmul.mubr.f32.vlgmr.msra.gmra.mrb[0].mxu1 %v3782_v4  ;;  %4613 = vst [vmem:[#allocation85_spill] sm:$0xff] %v3807_v7  ;;  %v3811_v1 = vld [vmem:[#allocation7 + $0xa8] sm:$0xff]  ;;  %v3827_v18 = vpack.c.bf16 %v1730_v49, %v1726_v48  ;;  %v1736_v63 = vand.u32 4294901760, %v799_v51  ;;  %v1740_v26 = vand.u32 4294901760, %v801_v50  ;;  %v814_v49 = vld [vmem:[#allocation7 + $0xf8] sm:$0xff] }
 0x1a9   :  { %2912 = vmatpush1.bf16.msra.mxu1 %v3775_v38  ;;  %4614 = vst [vmem:[#allocation86_spill] sm:$0xff] %v3809_v11  ;;  %1798 = vmatprep.mubr.f32.mxu1 %v4615_v61  ;;  %v1732_v38 = vand.u32 4294901760, %v797_v6  ;;  %v1744_v0 = vand.u32 4294901760, %v803_v19  ;;  %v1748_v5 = vand.u32 4294901760, %v805_v60  ;;  %v3837_v48 = vsub.f32 %v795_v56, %v1728_v12  ;;  %v812_v56 = vld [vmem:[#allocation7 + $0xe8] sm:$0xff] }
 0x1aa   :  { %4610 = vst [vmem:[#allocation82_spill] sm:$0xff] %v3799_v44  ;;  %2914 = vmatprep.subr.bf16.mxu1 %v3786_v2  ;;  %v4472_v41 = vand.u32 4294901760, %v3799_v44  ;;  %4616 = vst [vmem:[#allocation87_spill] sm:$0xff] %v3827_v18  ;;  %v3845_v9 = vsub.f32 %v802_v59, %v1738_v15  ;;  %v3849_v62 = vsub.f32 %v799_v51, %v1736_v63  ;;  %v811_v51 = vld [vmem:[#allocation7 + $0xe0] sm:$0xff]  ;;  %v1758_v39 = vand.u32 4294901760, %v812_v56 }
 0x1ab   :  { %v3835_v53 = vpack.c.bf16 %v1732_v38, %v1728_v12  ;;  %v1750_v12 = vand.u32 4294901760, %v808_v27  ;;  %v3863_v52 = vsub.f32 %v803_v19, %v1744_v0  ;;  %v4500_v19 = vand.u32 4294901760, %v3843_v8 }
 0x1ac   :  { %v947_v2 = vsub.f32 %v3799_v44, %v4472_v41  ;;  %v810_v41 = vld [vmem:[#allocation7 + $0xd8] sm:$0xff]  ;;  %v3839_v44 = vsub.f32 %v797_v6, %v1732_v38  ;;  %v4622_v38 = vld [vmem:[#allocation61_spill] sm:$0xff] }
 0x1ad   :  { %2916 = vmatpush1.bf16.msra.mxu1 %v3792_v13  ;;  %4618 = vst [vmem:[#allocation89_spill] sm:$0xff] %v3835_v53  ;;  %v3841_v13 = vpack.c.bf16 %v1738_v15, %v1734_v23  ;;  %v4623_v23 = vand.u32 4294901760, %v3811_v1  ;;  %v4624_v15 = vand.u32 4294901760, %v3818_v37  ;;  %v1754_v59 = vand.u32 4294901760, %v810_v41 }
 0x1ae   :  { %2918 = vmatprep.subr.bf16.mxu1 %v3802_v36  ;;  %v948_v57 = vand.u32 4294901760, %v947_v2  ;;  %v3847_v36 = vpack.c.bf16 %v1740_v26, %v1736_v63  ;;  %v3851_v2 = vsub.f32 %v801_v50, %v1740_v26  ;;  %v813_v50 = vld [vmem:[#allocation7 + $0xf0] sm:$0xff]  ;;  %v4627_v63 = vld [vmem:[#allocation62_spill] sm:$0xff]  ;;  %v3867_v26 = vsub.f32 %v805_v60, %v1748_v5 }
 0x1af   :  { %4619 = vst [vmem:[#allocation90_spill] sm:$0xff] %v3841_v13  ;;  %v3859_v6 = vpack.c.bf16 %v4624_v15, %v4623_v23  ;;  %v1762_v23 = vand.u32 4294901760, %v814_v49  ;;  %v1760_v15 = vand.u32 4294901760, %v811_v51  ;;  %v1764_v40 = vand.u32 4294901760, %v813_v50  ;;  %v4628_v60 = vld [vmem:[#allocation63_spill] sm:$0xff] }
 0x1b0   :  { %949 = vmatmul.mubr.f32.vlgmr.msra.gmra.mrb[2].mxu0 %v948_v57  ;;  %4620 = vst [vmem:[#allocation91_spill] sm:$0xff] %v3847_v36  ;;  %4621 = vst [vmem:[#allocation92_spill] sm:$0xff] %v3851_v2  ;;  %v3861_v57 = vpack.c.bf16 %v1748_v5, %v1744_v0  ;;  %v4499_v0 = vand.u32 4294901760, %v3845_v9  ;;  %v3878_v5 = vpack.c.bf16 %v1754_v59, %v1750_v12 }
 0x1b1   :  { %2752 = vmatpush1.bf16.msra.mxu0 %v4622_v38  ;;  %2920 = vmatpush1.bf16.msra.mxu1 %v3809_v11  ;;  %4625 = vst [vmem:[#allocation61_spill] sm:$0xff] %v3859_v6  ;;  %v3869_v38 = vsub.f32 %v808_v27, %v1750_v12  ;;  %v1752_v11 = vand.u32 4294901760, %v807_v54  ;;  %v3880_v27 = vsub.f32 %v810_v41, %v1754_v59  ;;  %v4633_v12 = vand.u32 4294901760, %v3849_v62 }
 0x1b2   :  { %4626 = vst [vmem:[#allocation93_spill] sm:$0xff] %v3861_v57  ;;  %2754 = vmatprep.subr.bf16.mxu0 %v4627_v63  ;;  %2922 = vmatprep.subr.bf16.mxu1 %v3827_v18  ;;  %4629 = vst [vmem:[#allocation62_spill] sm:$0xff] %v3878_v5  ;;  %v3887_v35 = vpack.c.bf16 %v4499_v0, %v4500_v19  ;;  %v3890_v63 = vand.u32 4294901760, %v3780_v3  ;;  %v4632_v18 = vld [vmem:[#allocation64_spill] sm:$0xff]  ;;  %v4634_v59 = vand.u32 4294901760, %v3851_v2  ;;  %v4506_v41 = vand.u32 4294901760, %v3863_v52 }
 0x1b3   :  { %1179 = vmatprep.mubr.f32.mxu0 %v4615_v61  ;;  %v3905_v0 = vsub.f32 %v809_v45, %v1756_v46  ;;  %v3907_v19 = vpack.c.bf16 %v1762_v23, %v1758_v39  ;;  %v4640_v45 = vand.u32 4294901760, %v3777_v14 }
 0x1b4   :  { %4630 = vst [vmem:[#allocation63_spill] sm:$0xff] %v3887_v35  ;;  %4631 = vst [vmem:[#allocation94_spill] sm:$0xff] %v3890_v63  ;;  %v3901_v34 = vpack.c.bf16 %v4634_v59, %v4633_v12  ;;  %v3909_v35 = vsub.f32 %v812_v56, %v1758_v39  ;;  %v3946_v56 = vsub.f32 %v813_v50, %v1764_v40  ;;  %v4647_v59 = vand.u32 4294901760, %v3790_v43 }
 0x1b5   :  { %2756 = vmatpush1.bf16.msra.mxu0 %v4628_v60  ;;  %2924 = vmatpush1.bf16.msra.mxu1 %v3835_v53  ;;  %v3894_v60 = vsub.f32 %v807_v54, %v1752_v11  ;;  %v3903_v53 = vpack.c.bf16 %v1756_v46, %v1752_v11  ;;  %4637 = vst [vmem:[#allocation96_spill] sm:$0xff] %v3907_v19  ;;  %v4650_v39 = vand.u32 4294901760, %v3794_v42 }
 0x1b6   :  { %2758 = vmatprep.subr.bf16.mxu0 %v4632_v18  ;;  %2926 = vmatprep.subr.bf16.mxu1 %v3841_v13  ;;  %4635 = vst [vmem:[#allocation64_spill] sm:$0xff] %v3901_v34  ;;  %v3911_v18 = vsub.f32 %v814_v49, %v1762_v23  ;;  %v3913_v54 = vpack.c.bf16 %v1764_v40, %v1760_v15  ;;  %v4505_v13 = vand.u32 4294901760, %v3867_v26  ;;  %v4642_v23 = vld [vmem:[#allocation66_spill] sm:$0xff]  ;;  %v4645_v34 = vld [vmem:[#allocation67_spill] sm:$0xff] }
 0x1b7   :  { %4636 = vst [vmem:[#allocation95_spill] sm:$0xff] %v3903_v53  ;;  %v3919_v11 = vsub.f32 %v811_v51, %v1760_v15  ;;  %v1819_v46 = vsub.f32 %v3777_v14, %v4640_v45  ;;  %v3928_v49 = vsub.f32 %v3780_v3, %v3890_v63  ;;  %v4508_v45 = vand.u32 4294901760, %v3869_v38 }
 0x1b8   :  { %4638 = vst [vmem:[#allocation97_spill] sm:$0xff] %v3913_v54  ;;  %v3940_v12 = vpack.c.bf16 %v4505_v13, %v4506_v41  ;;  %v4513_v15 = vand.u32 4294901760, %v3894_v60  ;;  %v4646_v41 = vand.u32 4294901760, %v3788_v17  ;;  %v1849_v40 = vsub.f32 %v3790_v43, %v4647_v59 }
 0x1b9   :  { %2760 = vmatpush1.bf16.msra.mxu0 %v4639_v32  ;;  %2928 = vmatpush1.bf16.msra.mxu1 %v3847_v36  ;;  %4641 = vst [vmem:[#allocation65_spill] sm:$0xff] %v3928_v49  ;;  %v4643_v32 = vand.u32 4294901760, %v3784_v20  ;;  %v1820_v13 = vand.u32 4294901760, %v1819_v46  ;;  %v4651_v59 = vand.u32 4294901760, %v3905_v0 }
 0x1ba   :  { %2762 = vmatprep.subr.bf16.mxu0 %v4642_v23  ;;  %2930 = vmatprep.subr.bf16.mxu1 %v3859_v6  ;;  %4644 = vst [vmem:[#allocation66_spill] sm:$0xff] %v3940_v12  ;;  %v4507_v23 = vand.u32 4294901760, %v3880_v27  ;;  %v1837_v3 = vsub.f32 %v3788_v17, %v4646_v41  ;;  %v1843_v41 = vsub.f32 %v3794_v42, %v4650_v39  ;;  %v4655_v39 = vand.u32 4294901760, %v3807_v7 }
 0x1bb   :  { %v1831_v51 = vsub.f32 %v3784_v20, %v4643_v32  ;;  %v4649_v32 = vld [vmem:[#allocation68_spill] sm:$0xff]  ;;  %v3975_v12 = vpack.c.bf16 %v4651_v59, %v4513_v15  ;;  %v4524_v59 = vand.u32 4294901760, %v3919_v11  ;;  %v4658_v6 = vand.u32 4294901760, %v3911_v18 }
 0x1bc   :  { %v3963_v50 = vpack.c.bf16 %v4507_v23, %v4508_v45  ;;  %v4653_v23 = vand.u32 4294901760, %v3796_v21 }
 0x1bd   :  { %2764 = vmatpush1.bf16.msra.mxu0 %v4645_v34  ;;  %2932 = vmatpush1.bf16.msra.mxu1 %v3861_v57  ;;  %v1832_v46 = vand.u32 4294901760, %v1831_v51  ;;  %4652 = vst [vmem:[#allocation68_spill] sm:$0xff] %v3975_v12  ;;  %v4656_v12 = vld [vmem:[#allocation69_spill] sm:$0xff]  ;;  %v4657_v34 = vand.u32 4294901760, %v3909_v35  ;;  %v4661_v57 = vand.u32 4294901760, %v3928_v49 }
 0x1be   :  { %4648 = vst [vmem:[#allocation67_spill] sm:$0xff] %v3963_v50  ;;  %2766 = vmatprep.subr.bf16.mxu0 %v4649_v32  ;;  %2934 = vmatprep.subr.bf16.mxu1 %v3878_v5  ;;  %v1855_v45 = vsub.f32 %v3796_v21, %v4653_v23  ;;  %v4654_v32 = vand.u32 4294901760, %v3805_v55  ;;  %v1873_v5 = vsub.f32 %v3807_v7, %v4655_v39  ;;  %v1838_v23 = vand.u32 4294901760, %v1837_v3  ;;  %v4660_v39 = vld [vmem:[#allocation70_spill] sm:$0xff] }
 0x1bf   :  { %v3998_v36 = vpack.c.bf16 %v4658_v6, %v4657_v34  ;;  %v4664_v6 = vand.u32 4294901760, %v3811_v1 }
 0x1c0   :  { %v1861_v50 = vsub.f32 %v3805_v55, %v4654_v32  ;;  %v1850_v32 = vand.u32 4294901760, %v1849_v40  ;;  %v4662_v40 = vand.u32 4294901760, %v3946_v56 }
 0x1c1   :  { %2768 = vmatpush1.bf16.msra.mxu0 %v4656_v12  ;;  %2936 = vmatpush1.bf16.msra.mxu1 %v3903_v53  ;;  %4659 = vst [vmem:[#allocation69_spill] sm:$0xff] %v3998_v36  ;;  %v1802_v12 = vsub.f32 %v3928_v49, %v4661_v57  ;;  %v4016_v34 = vsub.f32 %v3811_v1, %v4664_v6  ;;  %v1856_v36 = vand.u32 4294901760, %v1855_v45  ;;  %v1874_v53 = vand.u32 4294901760, %v1873_v5 }
 0x1c2   :  { %2770 = vmatprep.subr.bf16.mxu0 %v4660_v39  ;;  %2938 = vmatprep.subr.bf16.mxu1 %v3907_v19  ;;  %v4011_v51 = vpack.c.bf16 %v4662_v40, %v4524_v59  ;;  %v1844_v39 = vand.u32 4294901760, %v1843_v41  ;;  %v1862_v19 = vand.u32 4294901760, %v1861_v50  ;;  %v4665_v57 = vand.u32 4294901760, %v3816_v10  ;;  %v4667_v59 = vld [vmem:[#allocation71_spill] sm:$0xff]  ;;  %v4669_v41 = vld [vmem:[#allocation73_spill] sm:$0xff] }
 0x1c3   :  { %v4666_v49 = vand.u32 4294901760, %v3818_v37  ;;  %v2943_v1 = vpack.c.bf16 %v1832_v46, %v1820_v13  ;;  %v4668_v45 = vand.u32 4294901760, %v3820_v16  ;;  %v1803_v6 = vand.u32 4294901760, %v1802_v12  ;;  %v4674_v12 = vld [vmem:[#allocation75_spill] sm:$0xff] }
 0x1c4   :  { %4663 = vst [vmem:[#allocation70_spill] sm:$0xff] %v4011_v51  ;;  %v1867_v15 = vsub.f32 %v3816_v10, %v4665_v57  ;;  %v4670_v57 = vld [vmem:[#allocation74_spill] sm:$0xff]  ;;  %v2945_v3 = vpack.c.bf16 %v1850_v32, %v1838_v23  ;;  %v2947_v46 = vpack.c.bf16 %v1856_v36, %v1844_v39  ;;  %v2949_v51 = vpack.c.bf16 %v1874_v53, %v1862_v19 }
 0x1c5   :  { %v4025_v40 = vsub.f32 %v3818_v37, %v4666_v49  ;;  %2772 = vmatpush1.bf16.msra.mxu0 %v4667_v59  ;;  %2940 = vmatpush1.bf16.msra.mxu1 %v3913_v54  ;;  %v1879_v5 = vsub.f32 %v3820_v16, %v4668_v45  ;;  %v4671_v37 = vand.u32 4294901760, %v3822_v22  ;;  %v4672_v59 = vand.u32 4294901760, %v3833_v58 }
 0x1c6   :  { %2774 = vmatprep.subr.bf16.mxu0 %v4669_v41  ;;  %2942 = vmatprep.subr.bf16.mxu1 %v4670_v57  ;;  %v1868_v45 = vand.u32 4294901760, %v1867_v15  ;;  %v4673_v50 = vand.u32 4294901760, %v3837_v48  ;;  %v4675_v32 = vand.u32 4294901760, %v3839_v44  ;;  %v4677_v19 = vand.u32 4294901760, %v3843_v8 }
 0x1c7   :  { %v1885_v49 = vsub.f32 %v3822_v22, %v4671_v37  ;;  %v1897_v13 = vsub.f32 %v3833_v58, %v4672_v59  ;;  %v1880_v23 = vand.u32 4294901760, %v1879_v5  ;;  %v4529_v37 = vand.u32 4294901760, %v4016_v34 }
 0x1c8   :  { %1804 = vmatmul.mubr.f32.vlgmr.msra.gmra.mrb[0].mxu1 %v1803_v6  ;;  %v1891_v41 = vsub.f32 %v3837_v48, %v4673_v50  ;;  %v1903_v57 = vsub.f32 %v3839_v44, %v4675_v32  ;;  %v4528_v59 = vand.u32 4294901760, %v4025_v40  ;;  %v4676_v6 = vld [vmem:[#allocation76_spill] sm:$0xff]  ;;  %v1909_v15 = vsub.f32 %v3843_v8, %v4677_v19  ;;  %v4681_v19 = vld [vmem:[#allocation57_spill] sm:$0xff] }
 0x1c9   :  { %2776 = vmatpush1.bf16.msra.mxu0 %v4674_v12  ;;  %2944 = vmatpush1.bf16.msra.mxu1 %v2943_v1  ;;  %v1886_v53 = vand.u32 4294901760, %v1885_v49  ;;  %v1898_v36 = vand.u32 4294901760, %v1897_v13  ;;  %v4678_v39 = vand.u32 4294901760, %v3845_v9  ;;  %v4679_v50 = vand.u32 4294901760, %v3849_v62 }
 0x1ca   :  { %2778 = vmatprep.subr.bf16.mxu0 %v4676_v6  ;;  %2946 = vmatprep.subr.bf16.mxu1 %v2945_v3  ;;  %v1892_v5 = vand.u32 4294901760, %v1891_v41  ;;  %v4680_v32 = vand.u32 4294901760, %v3851_v2  ;;  %v2951_v49 = vpack.c.bf16 %v1880_v23, %v1868_v45  ;;  %v1904_v13 = vand.u32 4294901760, %v1903_v57 }
 0x1cb   :  { %v1921_v1 = vsub.f32 %v3845_v9, %v4678_v39  ;;  %2034 = vmatprep.mubr.f32.mxu1 %v4615_v61  ;;  %v1915_v12 = vsub.f32 %v3849_v62, %v4679_v50  ;;  %v1933_v6 = vsub.f32 %v4016_v34, %v4529_v37  ;;  %v1945_v41 = vsub.f32 %v4025_v40, %v4528_v59  ;;  %v4682_v39 = vld [vmem:[#allocation56_spill] sm:$0xff] }
 0x1cc   :  { %v1927_v3 = vsub.f32 %v3851_v2, %v4680_v32  ;;  %v4683_v50 = vpack.c.bf16 %v4681_v19, %v4682_v39  ;;  %v2953_v54 = vpack.c.bf16 %v1898_v36, %v1886_v53  ;;  %v1910_v32 = vand.u32 4294901760, %v1909_v15 }
 0x1cd   :  { %2780 = vmatpush1.bf16.msra.mxu0 %v3727_v47  ;;  %2948 = vmatpush1.bf16.msra.mxu1 %v2947_v46  ;;  %v1922_v2 = vand.u32 4294901760, %v1921_v1  ;;  %v1916_v47 = vand.u32 4294901760, %v1915_v12  ;;  %v4684_v45 = vand.u32 4294901760, %v3863_v52  ;;  %v4685_v57 = vand.u32 4294901760, %v3867_v26 }
 0x1ce   :  { %2782 = vmatprep.subr.bf16.mxu0 %v4683_v50  ;;  %2950 = vmatprep.subr.bf16.mxu1 %v2949_v51  ;;  %v1928_v46 = vand.u32 4294901760, %v1927_v3  ;;  %v4686_v37 = vpack.c.bf16 %v3443_v25, %v3441_v24  ;;  %v2955_v51 = vpack.c.bf16 %v1904_v13, %v1892_v5  ;;  %v1934_v53 = vand.u32 4294901760, %v1933_v6 }
 0x1cf   :  { %v1939_v23 = vsub.f32 %v3863_v52, %v4684_v45  ;;  %v1951_v59 = vsub.f32 %v3867_v26, %v4685_v57  ;;  %v1946_v36 = vand.u32 4294901760, %v1945_v41  ;;  %v4687_v15 = vpack.c.bf16 %v3447_v29, %v3445_v28  ;;  %v4693_v57 = vld [vmem:[#allocation24_spill] sm:$0xff] }
 0x1d0   :  { %1181 = vmatmul.mubr.f32.vlgmr.msra.gmra.mrb[2].mxu0 %v3782_v4  ;;  %v2957_v1 = vpack.c.bf16 %v1922_v2, %v1910_v32  ;;  %v4688_v12 = vand.u32 4294901760, %v3869_v38  ;;  %v4689_v50 = vand.u32 4294901760, %v3880_v27  ;;  %v4690_v13 = vpack.c.bf16 %v3451_v31, %v3449_v30  ;;  %v4703_v4 = vld [vmem:[#allocation28_spill] sm:$0xff] }
 0x1d1   :  { %2784 = vmatpush1.bf16.msra.mxu0 %v4686_v37  ;;  %2952 = vmatpush1.bf16.msra.mxu1 %v2951_v49  ;;  %v2959_v37 = vpack.c.bf16 %v1928_v46, %v1916_v47  ;;  %v1940_v5 = vand.u32 4294901760, %v1939_v23  ;;  %v1952_v49 = vand.u32 4294901760, %v1951_v59  ;;  %v4691_v2 = vand.u32 4294901760, %v3894_v60 }
 0x1d2   :  { %2786 = vmatprep.subr.bf16.mxu0 %v4687_v15  ;;  %2954 = vmatprep.subr.bf16.mxu1 %v2953_v54  ;;  %v1957_v3 = vsub.f32 %v3869_v38, %v4688_v12  ;;  %v1969_v45 = vsub.f32 %v3880_v27, %v4689_v50  ;;  %v2961_v54 = vpack.c.bf16 %v1946_v36, %v1934_v53  ;;  %v4692_v41 = vand.u32 4294901760, %v3905_v0  ;;  %v4697_v12 = vld [vmem:[#allocation27_spill] sm:$0xff]  ;;  %v4698_v50 = vld [vmem:[#allocation26_spill] sm:$0xff] }
 0x1d3   :  { %1315 = vmatprep.mubr.f32.mxu0 %v4615_v61  ;;  %v1963_v6 = vsub.f32 %v3894_v60, %v4691_v2  ;;  %v4694_v15 = vpack.c.bf16 %v3455_v33, %v4693_v57  ;;  %v4695_v46 = vand.u32 4294901760, %v3909_v35  ;;  %v2963_v36 = vpack.c.bf16 %v1952_v49, %v1940_v5  ;;  %v4709_v57 = vld [vmem:[#allocation33_spill] sm:$0xff] }
 0x1d4   :  { %v1975_v32 = vsub.f32 %v3905_v0, %v4692_v41  ;;  %v1958_v59 = vand.u32 4294901760, %v1957_v3  ;;  %v1970_v47 = vand.u32 4294901760, %v1969_v45  ;;  %v4701_v45 = vand.u32 4294901760, %v3946_v56 }
 0x1d5   :  { %2788 = vmatpush1.bf16.msra.mxu0 %v4690_v13  ;;  %2956 = vmatpush1.bf16.msra.mxu1 %v2955_v51  ;;  %v1981_v23 = vsub.f32 %v3909_v35, %v4695_v46  ;;  %v4696_v51 = vand.u32 4294901760, %v3911_v18  ;;  %v4699_v13 = vpack.c.bf16 %v4697_v12, %v4698_v50  ;;  %v1964_v2 = vand.u32 4294901760, %v1963_v6  ;;  %v4702_v46 = vld [vmem:[#allocation29_spill] sm:$0xff]  ;;  %v4708_v50 = vld [vmem:[#allocation34_spill] sm:$0xff] }
 0x1d6   :  { %2790 = vmatprep.subr.bf16.mxu0 %v4694_v15  ;;  %2958 = vmatprep.subr.bf16.mxu1 %v2957_v1  ;;  %v1976_v41 = vand.u32 4294901760, %v1975_v32  ;;  %v4700_v1 = vand.u32 4294901760, %v3919_v11  ;;  %v1999_v15 = vsub.f32 %v3946_v56, %v4701_v45  ;;  %v4704_v33 = vpack.c.bf16 %v4702_v46, %v4703_v4  ;;  %v4711_v46 = vld [vmem:[#allocation37_spill] sm:$0xff] }
 0x1d7   :  { %v1993_v53 = vsub.f32 %v3911_v18, %v4696_v51  ;;  %v2965_v5 = vpack.c.bf16 %v1970_v47, %v1958_v59  ;;  %v1982_v49 = vand.u32 4294901760, %v1981_v23  ;;  %v4710_v31 = vpack.c.bf16 %v4708_v50, %v4709_v57  ;;  %v4714_v47 = vld [vmem:[#allocation40_spill] sm:$0xff]  ;;  %v4715_v23 = vld [vmem:[#allocation39_spill] sm:$0xff] }
 0x1d8   :  { %v1987_v3 = vsub.f32 %v3919_v11, %v4700_v1  ;;  %v2967_v32 = vpack.c.bf16 %v1976_v41, %v1964_v2  ;;  %v2000_v1 = vand.u32 4294901760, %v1999_v15  ;;  %v4718_v2 = vld [vmem:[#allocation42_spill] sm:$0xff]  ;;  %v4721_v15 = vld [vmem:[#allocation45_spill] sm:$0xff] }
 0x1d9   :  { %2792 = vmatpush1.bf16.msra.mxu0 %v4699_v13  ;;  %2960 = vmatpush1.bf16.msra.mxu1 %v2959_v37  ;;  %v1994_v51 = vand.u32 4294901760, %v1993_v53  ;;  %v4705_v13 = vld [vmem:[#allocation31_spill] sm:$0xff]  ;;  %v4706_v37 = vld [vmem:[#allocation30_spill] sm:$0xff]  ;;  %v4716_v53 = vpack.c.bf16 %v4714_v47, %v4715_v23 }
 0x1da   :  { %2794 = vmatprep.subr.bf16.mxu0 %v4704_v33  ;;  %2962 = vmatprep.subr.bf16.mxu1 %v2961_v54  ;;  %v4707_v6 = vpack.c.bf16 %v4705_v13, %v4706_v37  ;;  %v1988_v12 = vand.u32 4294901760, %v1987_v3  ;;  %v4712_v33 = vld [vmem:[#allocation36_spill] sm:$0xff]  ;;  %v4720_v3 = vld [vmem:[#allocation46_spill] sm:$0xff] }
 0x1db   :  { %v2969_v45 = vpack.c.bf16 %v1994_v51, %v1982_v49  ;;  %v4713_v54 = vpack.c.bf16 %v4711_v46, %v4712_v33  ;;  %v4723_v49 = vld [vmem:[#allocation58_spill] sm:$0xff]  ;;  %v4724_v51 = vld [vmem:[#allocation55_spill] sm:$0xff] }
 0x1dc   :  { %v2971_v59 = vpack.c.bf16 %v2000_v1, %v1988_v12  ;;  %v4725_v12 = vpack.c.bf16 %v4723_v49, %v4724_v51  ;;  %v4727_v1 = vld [vmem:[#allocation47_spill] sm:$0xff] }
 0x1dd   :  { %2796 = vmatpush1.bf16.msra.mxu0 %v4707_v6  ;;  %2964 = vmatpush1.bf16.msra.mxu1 %v2963_v36  ;;  %v4717_v36 = vld [vmem:[#allocation43_spill] sm:$0xff]  ;;  %v2977_v6 = vpack.c.bf16 %v3790_v43, %v3788_v17 }
 0x1de   :  { %2798 = vmatprep.subr.bf16.mxu0 %v4710_v31  ;;  %2966 = vmatprep.subr.bf16.mxu1 %v2965_v5  ;;  %v4719_v41 = vpack.c.bf16 %v4717_v36, %v4718_v2  ;;  %v2975_v31 = vpack.c.bf16 %v3784_v20, %v3777_v14  ;;  %v4722_v5 = vpack.c.bf16 %v4720_v3, %v4721_v15 }
 0x1e1   :  { %2800 = vmatpush1.bf16.msra.mxu0 %v4713_v54  ;;  %2968 = vmatpush1.bf16.msra.mxu1 %v2967_v32  ;;  %v4726_v32 = vld [vmem:[#allocation49_spill] sm:$0xff]  ;;  %v2979_v54 = vpack.c.bf16 %v3796_v21, %v3794_v42  ;;  %v4737_v21 = vld [vmem:[#allocation16_spill] sm:$0xff] }
 0x1e2   :  { %2802 = vmatprep.subr.bf16.mxu0 %v4716_v53  ;;  %2970 = vmatprep.subr.bf16.mxu1 %v2969_v45  ;;  %v4728_v45 = vpack.c.bf16 %v4726_v32, %v4727_v1  ;;  %v4730_v53 = vld [vmem:[#allocation51_spill] sm:$0xff] }
 0x1e5   :  { %2804 = vmatpush1.bf16.msra.mxu0 %v4719_v41  ;;  %2972 = vmatpush1.bf16.msra.mxu1 %v2971_v59  ;;  %v4729_v59 = vld [vmem:[#allocation52_spill] sm:$0xff] }
 0x1e6   :  { %2806 = vmatprep.subr.bf16.mxu0 %v4722_v5  ;;  %2974 = vmatprep.subr.bf16.mxu1 %v4725_v12  ;;  %v4731_v41 = vpack.c.bf16 %v4729_v59, %v4730_v53  ;;  %v2981_v5 = vpack.c.bf16 %v3807_v7, %v3805_v55  ;;  %v4732_v12 = vld [vmem:[#allocation54_spill] sm:$0xff]  ;;  %v2987_v7 = vpack.c.bf16 %v3839_v44, %v3837_v48  ;;  %v4738_v55 = vld [vmem:[#allocation17_spill] sm:$0xff] }
 0x1e8   :  { %2036 = vmatmul.mubr.f32.vlgmr.msra.gmra.mrb[0].mxu1 %v3890_v63  ;;  %v4733_v63 = vld [vmem:[#allocation53_spill] sm:$0xff] }
 0x1e9   :  { %2808 = vmatpush1.bf16.msra.mxu0 %v4728_v45  ;;  %2976 = vmatpush1.bf16.msra.mxu1 %v2975_v31  ;;  %v4734_v43 = vpack.c.bf16 %v4732_v12, %v4733_v63  ;;  %v2983_v31 = vpack.c.bf16 %v3820_v16, %v3816_v10  ;;  %v4735_v45 = vld [vmem:[#allocation15_spill] sm:$0xff] }
 0x1ea   :  { %2810 = vmatprep.subr.bf16.mxu0 %v4731_v41  ;;  %2978 = vmatprep.subr.bf16.mxu1 %v2977_v6  ;;  %v2985_v41 = vpack.c.bf16 %v3833_v58, %v3822_v22  ;;  %v4736_v6 = vld [vmem:[#allocation82_spill] sm:$0xff]  ;;  %v4741_v58 = vld [vmem:[#allocation19_spill] sm:$0xff] }
 0x1eb   :  { %2170 = vmatprep.mubr.f32.mxu1 %v4615_v61 }
 0x1ed   :  { %2812 = vmatpush1.bf16.msra.mxu0 %v4734_v43  ;;  %2980 = vmatpush1.bf16.msra.mxu1 %v2979_v54  ;;  %v2989_v43 = vpack.c.bf16 %v3845_v9, %v3843_v8  ;;  %v4739_v54 = vld [vmem:[#allocation18_spill] sm:$0xff]  ;;  %v2995_v8 = vpack.c.bf16 %v3867_v26, %v3863_v52  ;;  %v4743_v9 = vld [vmem:[#allocation21_spill] sm:$0xff]  ;;  %v3003_v52 = vpack.c.bf16 %v3946_v56, %v3919_v11  ;;  %v4756_v11 = vand.u32 4294901760, %v4682_v39 }
 0x1ee   :  { %2814 = vmatprep.subr.bf16.mxu0 %v4735_v45  ;;  %2982 = vmatprep.subr.bf16.mxu1 %v2981_v5  ;;  %v4740_v5 = vld [vmem:[#allocation92_spill] sm:$0xff]  ;;  %v4747_v26 = vld [vmem:[#allocation38_spill] sm:$0xff]  ;;  %v4757_v56 = vand.u32 4294901760, %v4681_v19  ;;  %v4764_v39 = vand.u32 4294901760, %v3447_v29 }
 0x1ef   :  { %v2991_v45 = vpack.c.bf16 %v4740_v5, %v3849_v62  ;;  %v4745_v62 = vld [vmem:[#allocation32_spill] sm:$0xff]  ;;  %v4755_v5 = vld [vmem:[#allocation78_spill] sm:$0xff] }
 0x1f0   :  { %1318 = vmatmul.mubr.f32.vlgmr.msra.gmra.mrb[2].mxu0 %v4736_v6 }
 0x1f1   :  { %2816 = vmatpush1.bf16.msra.mxu0 %v4737_v21  ;;  %2984 = vmatpush1.bf16.msra.mxu1 %v2983_v31  ;;  %v2993_v21 = vpack.c.bf16 %v4025_v40, %v4016_v34  ;;  %v4742_v31 = vld [vmem:[#allocation20_spill] sm:$0xff] }
 0x1f2   :  { %2818 = vmatprep.subr.bf16.mxu0 %v4738_v55  ;;  %2986 = vmatprep.subr.bf16.mxu1 %v2985_v41  ;;  %v2997_v55 = vpack.c.bf16 %v3880_v27, %v3869_v38  ;;  %v3001_v41 = vpack.c.bf16 %v3911_v18, %v3909_v35  ;;  %v4748_v38 = vld [vmem:[#allocation41_spill] sm:$0xff]  ;;  %v4749_v27 = vld [vmem:[#allocation44_spill] sm:$0xff]  ;;  %v4754_v18 = vld [vmem:[#allocation50_spill] sm:$0xff] }
 0x1f3   :  { %1420 = vmatprep.mubr.f32.mxu0 %v4615_v61  ;;  %v4753_v35 = vld [vmem:[#allocation72_spill] sm:$0xff] }
 0x1f5   :  { %2820 = vmatpush1.bf16.msra.mxu0 %v4739_v54  ;;  %2988 = vmatpush1.bf16.msra.mxu1 %v2987_v7  ;;  %v4744_v7 = vld [vmem:[#allocation22_spill] sm:$0xff]  ;;  %v4752_v54 = vld [vmem:[#allocation48_spill] sm:$0xff] }
 0x1f6   :  { %2822 = vmatprep.subr.bf16.mxu0 %v4741_v58  ;;  %2990 = vmatprep.subr.bf16.mxu1 %v2989_v43  ;;  %v2999_v58 = vpack.c.bf16 %v3905_v0, %v3894_v60  ;;  %v4746_v43 = vld [vmem:[#allocation35_spill] sm:$0xff]  ;;  %v4750_v0 = vld [vmem:[#allocation60_spill] sm:$0xff]  ;;  %v4751_v60 = vld [vmem:[#allocation65_spill] sm:$0xff] }
 0x1f9   :  { %2824 = vmatpush1.bf16.msra.mxu0 %v4742_v31  ;;  %2992 = vmatpush1.bf16.msra.mxu1 %v2991_v45  ;;  %v2845_v45 = vpack.c.bf16 %v4757_v56, %v4756_v11  ;;  %v4759_v31 = vld [vmem:[#allocation80_spill] sm:$0xff]  ;;  %v4778_v56 = vld [vmem:[#allocation27_spill] sm:$0xff] }
 0x1fa   :  { %2826 = vmatprep.subr.bf16.mxu0 %v4743_v9  ;;  %2994 = vmatprep.subr.bf16.mxu1 %v2993_v21  ;;  %v4758_v21 = vld [vmem:[#allocation59_spill] sm:$0xff]  ;;  %v4761_v9 = vand.u32 4294901760, %v3443_v25 }
 0x1fd   :  { %2828 = vmatpush1.bf16.msra.mxu0 %v4744_v7  ;;  %2996 = vmatpush1.bf16.msra.mxu1 %v2995_v8  ;;  %v4760_v8 = vand.u32 4294901760, %v3441_v24  ;;  %v4762_v7 = vld [vmem:[#allocation83_spill] sm:$0xff] }
 0x1fe   :  { %2830 = vmatprep.subr.bf16.mxu0 %v4745_v62  ;;  %2998 = vmatprep.subr.bf16.mxu1 %v2997_v55  ;;  %v4765_v62 = vand.u32 4294901760, %v4736_v6  ;;  %v4768_v24 = vld [vmem:[#allocation23_spill] sm:$0xff]  ;;  %v4775_v6 = vld [vmem:[#allocation89_spill] sm:$0xff] }
 0x1ff   :  { %v2847_v55 = vpack.c.bf16 %v4761_v9, %v4760_v8  ;;  %v4781_v8 = vand.u32 4294901760, %v4703_v4  ;;  %v4782_v9 = vld [vmem:[#allocation29_spill] sm:$0xff] }
 0x200   :  { %v4790_v4 = vld [vmem:[#allocation93_spill] sm:$0xff] }
 0x201   :  { %2832 = vmatpush1.bf16.msra.mxu0 %v4746_v43  ;;  %3000 = vmatpush1.bf16.msra.mxu1 %v2999_v58  ;;  %v4763_v58 = vand.u32 4294901760, %v3445_v28  ;;  %v4767_v43 = vand.u32 4294901760, %v3449_v30  ;;  %v4773_v28 = vld [vmem:[#allocation25_spill] sm:$0xff]  ;;  %v4779_v30 = vand.u32 4294901760, %v4778_v56 }
 0x202   :  { %2834 = vmatprep.subr.bf16.mxu0 %v4747_v26  ;;  %3002 = vmatprep.subr.bf16.mxu1 %v3001_v41  ;;  %v4766_v41 = vld [vmem:[#allocation86_spill] sm:$0xff]  ;;  %v4770_v26 = vld [vmem:[#allocation87_spill] sm:$0xff] }
 0x203   :  { %v2849_v19 = vpack.c.bf16 %v4764_v39, %v4763_v58  ;;  %v4784_v39 = vld [vmem:[#allocation91_spill] sm:$0xff] }
 0x205   :  { %2836 = vmatpush1.bf16.msra.mxu0 %v4748_v38  ;;  %3004 = vmatpush1.bf16.msra.mxu1 %v3003_v52  ;;  %v4769_v52 = vand.u32 4294901760, %v4768_v24  ;;  %v4771_v38 = vld [vmem:[#allocation24_spill] sm:$0xff]  ;;  %v4787_v24 = vld [vmem:[#allocation61_spill] sm:$0xff] }
 0x206   :  { %2838 = vmatprep.subr.bf16.mxu0 %v4749_v27  ;;  %3006 = vmatprep.subr.bf16.mxu1 %v4750_v0  ;;  %v4772_v27 = vand.u32 4294901760, %v4771_v38 }
 0x207   :  { %v2851_v25 = vpack.c.bf16 %v4769_v52, %v4767_v43  ;;  %v4788_v52 = vand.u32 4294901760, %v4709_v57  ;;  %v4796_v57 = vld [vmem:[#allocation95_spill] sm:$0xff] }
 0x208   :  { %2173 = vmatmul.mubr.f32.vlgmr.msra.gmra.mrb[0].mxu1 %v4751_v60 }
 0x209   :  { %2840 = vmatpush1.bf16.msra.mxu0 %v4752_v54  ;;  %3008 = vmatpush1.bf16.msra.mxu1 %v4753_v35  ;;  %v4774_v54 = vand.u32 4294901760, %v4773_v28  ;;  %v4792_v28 = vand.u32 4294901760, %v4711_v46  ;;  %v4800_v46 = vand.u32 4294901760, %v4721_v15  ;;  %v4808_v15 = vand.u32 4294901760, %v3784_v20 }
 0x20a   :  { %2842 = vmatprep.subr.bf16.mxu0 %v4754_v18  ;;  %3010 = vmatprep.subr.bf16.mxu1 %v4755_v5  ;;  %v4776_v18 = vld [vmem:[#allocation26_spill] sm:$0xff]  ;;  %v4816_v20 = vand.u32 4294901760, %v4732_v12  ;;  %v4825_v12 = vand.u32 4294901760, %v3820_v16  ;;  %v4833_v16 = vand.u32 4294901760, %v4016_v34 }
 0x20b   :  { %2275 = vmatprep.mubr.f32.mxu1 %v4615_v61  ;;  %v2853_v29 = vpack.c.bf16 %v4774_v54, %v4772_v27  ;;  %v4777_v11 = vand.u32 4294901760, %v4776_v18  ;;  %v4791_v27 = vand.u32 4294901760, %v4712_v33  ;;  %v4799_v33 = vld [vmem:[#allocation96_spill] sm:$0xff] }
 0x20d   :  { %2844 = vmatpush1.bf16.msra.mxu0 %v4758_v21  ;;  %3012 = vmatpush1.bf16.msra.mxu1 %v4759_v31  ;;  %v4780_v21 = vld [vmem:[#allocation90_spill] sm:$0xff]  ;;  %v2863_v54 = vpack.c.bf16 %v4792_v28, %v4791_v27 }
 0x20e   :  { %2846 = vmatprep.subr.bf16.mxu0 %v2845_v45  ;;  %3014 = vmatprep.subr.bf16.mxu1 %v4762_v7  ;;  %v2855_v45 = vpack.c.bf16 %v4779_v30, %v4777_v11  ;;  %v4798_v11 = vand.u32 4294901760, %v4717_v36  ;;  %v4801_v30 = vand.u32 4294901760, %v4720_v3  ;;  %v4806_v36 = vand.u32 4294901760, %v4726_v32 }
 0x20f   :  { %v4809_v3 = vand.u32 4294901760, %v4730_v53  ;;  %v4814_v32 = vand.u32 4294901760, %v4751_v60  ;;  %v4817_v53 = vand.u32 4294901760, %v3794_v42  ;;  %v4826_v42 = vand.u32 4294901760, %v3822_v22 }
 0x210   :  { %1424 = vmatmul.mubr.f32.vlgmr.msra.gmra.mrb[2].mxu0 %v4765_v62  ;;  %v4786_v62 = vand.u32 4294901760, %v4705_v13  ;;  %v4794_v13 = vand.u32 4294901760, %v4715_v23  ;;  %v4802_v23 = vand.u32 4294901760, %v4724_v51 }
 0x211   :  { %2848 = vmatpush1.bf16.msra.mxu0 %v2847_v55  ;;  %3016 = vmatpush1.bf16.msra.mxu1 %v4766_v41  ;;  %v4783_v55 = vand.u32 4294901760, %v4782_v9  ;;  %v4804_v9 = vld [vmem:[#allocation97_spill] sm:$0xff] }
 0x212   :  { %2850 = vmatprep.subr.bf16.mxu0 %v2849_v19  ;;  %3018 = vmatprep.subr.bf16.mxu1 %v4770_v26  ;;  %v4785_v19 = vand.u32 4294901760, %v4706_v37  ;;  %v4793_v37 = vld [vmem:[#allocation62_spill] sm:$0xff] }
 0x213   :  { %1590 = vmatprep.mubr.f32.mxu0 %v4615_v61  ;;  %v2857_v58 = vpack.c.bf16 %v4783_v55, %v4781_v8 }
 0x214   :  { %v2859_v43 = vpack.c.bf16 %v4786_v62, %v4785_v19  ;;  %v4811_v62 = vand.u32 4294901760, %v3788_v17  ;;  %v4820_v17 = vld [vmem:[#allocation84_spill] sm:$0xff] }
 0x215   :  { %2852 = vmatpush1.bf16.msra.mxu0 %v2851_v25  ;;  %3020 = vmatpush1.bf16.msra.mxu1 %v4775_v6  ;;  %v4789_v25 = vand.u32 4294901760, %v4708_v50  ;;  %v4797_v50 = vand.u32 4294901760, %v4718_v2  ;;  %v4805_v2 = vand.u32 4294901760, %v4727_v1  ;;  %v4821_v28 = vand.u32 4294901760, %v4820_v17 }
 0x216   :  { %2854 = vmatprep.subr.bf16.mxu0 %v2853_v29  ;;  %3022 = vmatprep.subr.bf16.mxu1 %v4780_v21  ;;  %v4795_v29 = vand.u32 4294901760, %v4714_v47  ;;  %v4803_v47 = vand.u32 4294901760, %v4723_v49  ;;  %v4810_v49 = vand.u32 4294901760, %v4729_v59 }
 0x217   :  { %v2861_v38 = vpack.c.bf16 %v4789_v25, %v4788_v52  ;;  %v2867_v56 = vpack.c.bf16 %v4798_v11, %v4797_v50  ;;  %v2871_v55 = vpack.c.bf16 %v4806_v36, %v4805_v2  ;;  %v4837_v2 = vld [vmem:[#allocation67_spill] sm:$0xff]  ;;  %v4840_v36 = vld [vmem:[#allocation70_spill] sm:$0xff] }
 0x218   :  { %v2865_v18 = vpack.c.bf16 %v4795_v29, %v4794_v13  ;;  %v3037_v8 = vpack.c.bf16 %v4803_v47, %v4802_v23  ;;  %v2873_v51 = vpack.c.bf16 %v4810_v49, %v4809_v3  ;;  %v4834_v23 = vand.u32 4294901760, %v4025_v40  ;;  %v4835_v47 = vld [vmem:[#allocation64_spill] sm:$0xff] }
 0x219   :  { %2856 = vmatpush1.bf16.msra.mxu0 %v2855_v45  ;;  %3024 = vmatpush1.bf16.msra.mxu1 %v4784_v39  ;;  %v2869_v45 = vpack.c.bf16 %v4801_v30, %v4800_v46  ;;  %v4830_v46 = vand.u32 4294901760, %v3837_v48  ;;  %v4831_v30 = vand.u32 4294901760, %v3839_v44  ;;  %v4838_v48 = vld [vmem:[#allocation68_spill] sm:$0xff]  ;;  %v4839_v44 = vld [vmem:[#allocation69_spill] sm:$0xff] }
 0x21a   :  { %2858 = vmatprep.subr.bf16.mxu0 %v2857_v58  ;;  %3026 = vmatprep.subr.bf16.mxu1 %v4787_v24  ;;  %v4807_v58 = vand.u32 4294901760, %v3777_v14  ;;  %v4815_v14 = vand.u32 4294901760, %v4733_v63  ;;  %v4824_v63 = vand.u32 4294901760, %v3816_v10  ;;  %v4832_v10 = vld [vmem:[#allocation63_spill] sm:$0xff]  ;;  %v3057_v22 = vpack.c.bf16 %v4834_v23, %v4833_v16 }
 0x21c   :  { %v3039_v19 = vpack.c.bf16 %v4808_v15, %v4807_v58  ;;  %v2875_v25 = vpack.c.bf16 %v4816_v20, %v4815_v14  ;;  %v3047_v29 = vpack.c.bf16 %v4825_v12, %v4824_v63 }
 0x21d   :  { %2860 = vmatpush1.bf16.msra.mxu0 %v2859_v43  ;;  %3028 = vmatpush1.bf16.msra.mxu1 %v4790_v4  ;;  %v4812_v43 = vld [vmem:[#allocation79_spill] sm:$0xff] }
 0x21e   :  { %2862 = vmatprep.subr.bf16.mxu0 %v2861_v38  ;;  %3030 = vmatprep.subr.bf16.mxu1 %v4793_v37  ;;  %v4813_v52 = vand.u32 4294901760, %v4812_v43  ;;  %v4818_v38 = vld [vmem:[#allocation81_spill] sm:$0xff] }
 0x21f   :  { %v4819_v59 = vand.u32 4294901760, %v4818_v38 }
 0x220   :  { %v3041_v1 = vpack.c.bf16 %v4813_v52, %v4811_v62 }
 0x221   :  { %2864 = vmatpush1.bf16.msra.mxu0 %v2863_v54  ;;  %3032 = vmatpush1.bf16.msra.mxu1 %v4796_v57  ;;  %v3043_v27 = vpack.c.bf16 %v4819_v59, %v4817_v53  ;;  %v4822_v54 = vld [vmem:[#allocation85_spill] sm:$0xff] }
 0x222   :  { %2866 = vmatprep.subr.bf16.mxu0 %v2865_v18  ;;  %3034 = vmatprep.subr.bf16.mxu1 %v4799_v33  ;;  %v4823_v13 = vand.u32 4294901760, %v4822_v54  ;;  %v4827_v18 = vld [vmem:[#allocation88_spill] sm:$0xff] }
 0x223   :  { %v4828_v50 = vand.u32 4294901760, %v4827_v18 }
 0x224   :  { %v3045_v60 = vpack.c.bf16 %v4823_v13, %v4821_v28 }
 0x225   :  { %2868 = vmatpush1.bf16.msra.mxu0 %v2867_v56  ;;  %3036 = vmatpush1.bf16.msra.mxu1 %v4804_v9  ;;  %v3049_v11 = vpack.c.bf16 %v4828_v50, %v4826_v42  ;;  %v4829_v56 = vld [vmem:[#allocation77_spill] sm:$0xff] }
 0x226   :  { %2870 = vmatprep.subr.bf16.mxu0 %v2869_v45  ;;  %3038 = vmatprep.subr.bf16.mxu1 %v3037_v8  ;;  %v3051_v45 = vpack.c.bf16 %v4831_v30, %v4830_v46  ;;  %v4836_v8 = vld [vmem:[#allocation66_spill] sm:$0xff] }
 0x228   :  { %2279 = vmatmul.mubr.f32.vlgmr.msra.gmra.mrb[0].mxu1 %v4814_v32 }
 0x229   :  { %2872 = vmatpush1.bf16.msra.mxu0 %v2871_v55  ;;  %3040 = vmatpush1.bf16.msra.mxu1 %v3039_v19  ;;  %v4841_v55 = vld [vmem:[#allocation94_spill] sm:$0xff] }
 0x22a   :  { %2874 = vmatprep.subr.bf16.mxu0 %v2873_v51  ;;  %3042 = vmatprep.subr.bf16.mxu1 %v3041_v1 }
 0x22b   :  { %2445 = vmatprep.mubr.f32.mxu1 %v4615_v61 }
 0x22d   :  { %2876 = vmatpush1.bf16.msra.mxu0 %v2875_v25  ;;  %3044 = vmatpush1.bf16.msra.mxu1 %v3043_v27 }
 0x22e   :  { %3046 = vmatprep.subr.bf16.mxu1 %v3045_v60 }
 0x230   :  { %1592 = vmatmul.mubr.f32.vlgmr.msra.gmra.mrb[2].mxu0 %v4829_v56 }
 0x231   :  { %3048 = vmatpush1.bf16.msra.mxu1 %v3047_v29 }
 0x232   :  { %3050 = vmatprep.subr.bf16.mxu1 %v3049_v11 }
 0x235   :  { %3052 = vmatpush1.bf16.msra.mxu1 %v3051_v45 }
 0x236   :  { %3054 = vmatprep.subr.bf16.mxu1 %v4832_v10 }
 0x239   :  { %3056 = vmatpush1.bf16.msra.mxu1 %v4835_v47 }
 0x23a   :  { %3058 = vmatprep.subr.bf16.mxu1 %v3057_v22 }
 0x23d   :  { %3060 = vmatpush1.bf16.msra.mxu1 %v4836_v8 }
 0x23e   :  { %3062 = vmatprep.subr.bf16.mxu1 %v4837_v2 }
 0x241   :  { %3064 = vmatpush1.bf16.msra.mxu1 %v4838_v48 }
 0x242   :  { %3066 = vmatprep.subr.bf16.mxu1 %v4839_v44 }
 0x245   :  { %3068 = vmatpush1.bf16.msra.mxu1 %v4840_v36 }
 0x246   :  { %3070 = vmatprep.subr.bf16.mxu1 %v4750_v0 }
 0x248   :  { %2447 = vmatmul.mubr.f32.vlgmr.msra.gmra.mrb[0].mxu1 %v4841_v55 }
 0x249   :  { %3072 = vmatpush1.bf16.msra.mxu1 %v4753_v35  ;;  %2549 = vmatprep.mubr.f32.mxu1 %v4615_v61 }
 0x24a   :  { %3074 = vmatprep.subr.bf16.mxu1 %v4755_v5 }
 0x24d   :  { %3076 = vmatpush1.bf16.msra.mxu1 %v4759_v31 }
 0x24e   :  { %3078 = vmatprep.subr.bf16.mxu1 %v4762_v7 }
 0x251   :  { %3080 = vmatpush1.bf16.msra.mxu1 %v4766_v41 }
 0x252   :  { %3082 = vmatprep.subr.bf16.mxu1 %v4770_v26 }
 0x255   :  { %3084 = vmatpush1.bf16.msra.mxu1 %v4775_v6 }
 0x256   :  { %3086 = vmatprep.subr.bf16.mxu1 %v4780_v21 }
 0x259   :  { %3088 = vmatpush1.bf16.msra.mxu1 %v4784_v39 }
 0x25a   :  { %3090 = vmatprep.subr.bf16.mxu1 %v4787_v24 }
 0x25d   :  { %3092 = vmatpush1.bf16.msra.mxu1 %v4790_v4 }
 0x25e   :  { %3094 = vmatprep.subr.bf16.mxu1 %v4793_v37 }
 0x261   :  { %3096 = vmatpush1.bf16.msra.mxu1 %v4796_v57 }
 0x262   :  { %3098 = vmatprep.subr.bf16.mxu1 %v4799_v33 }
 0x265   :  { %3100 = vmatpush1.bf16.msra.mxu1 %v4804_v9 }
 0x268   :  { %2551 = vmatmul.mubr.f32.vlgmr.msra.gmra.mrb[0].mxu1 %v4841_v55 }
 0x303   :  { %v1593_v61 = vpop.f32.mrb[2].mxu0 }
 0x304   :  { %v1595_v34 = vpop.f32.mrb[3].mxu0 }
 0x33b   :  { %v2552_v40 = vpop.f32.mrb[0].mxu1 }
 0x33c   :  { %v3101_v0 = vadd.f32 %v2552_v40, %v1593_v61  ;;  %v2554_v35 = vpop.f32.mrb[1].mxu1 }
 0x33d   :  { %v3102_v5 = vadd.f32 %v2554_v35, %v1595_v34 }
 0x33e   :  { %2557 = vst [vmem:[#allocation10] sm:$0xff] %v3101_v0 }
 0x33f   :  { %2558 = vst [vmem:[#allocation10 + $0x8] sm:$0xff] %v3102_v5 }
 0x340   :  { %3258 = shalt.err (!%p3255_p8)
}
 0x341   :  { %s3259_s21 = scalar_lea.hbm %s4372_s5, 256 }
 0x342   :  { %p3260_p9 = scmp.ne.s32.totalorder %s4372_s5, %s3259_s21  ;;  %p3263_p10 = scmp.lt.u32.totalorder %s3259_s21, %s4372_s5 }
 0x344   :  { %p3265_p11 = pnand %p3263_p10, %p3260_p9 }
 0x346   :  { %3268 = shalt.err (!%p3265_p11)
}
 0x347   :  { %2568 = dma.vmem_to_hbm [thread:$0]  %s2566_s2, 256, %s4372_s5, [#allocation4]  }
 0x348   :  { %3275 = dma.done.wait [#allocation4], 256  }
 0x349   :  { %3276 = vsyncadd [#allocation4], 4294967040 }
 0x34a   :  { %2572 = vsyncpa [#allocation3], 1 }
 0x34b   :  { %2573 = vsyncpa [#allocation6], 1 }
 0x34c   :  { %2574 = vsyncpa [#allocation9], 1 }
 0x34d   :  { %2575 = vsyncpa [#allocation4], 1 }

</bundles_post_ra>
